<compile_context>
chip_gen: v5e
topology: v5e:2x2
jax: 0.10.0
libtpu: 0.0.40
codegen_flags: <defaults>
</compile_context>

<pallas_src>
import jax
import jax.numpy as jnp
from jax.experimental import pallas as pl
from jax.experimental.pallas import tpu as pltpu


def _offset_branch_kernel(x_ref, w1_ref, b1_ref, w2_ref, b2_ref, w3_ref, b3_ref,
                          o_ref):
    # x_ref: (1, C_in, tile_n) f32 NCW slab; w*: bf16 BN-folded; b*: f32.
    # In-kernel cast (VPU op, hidden under MXU) — no standalone XLA cast pass.
    x = x_ref[0].astype(jnp.bfloat16)                              # (C_in, tn)

    # Layer 1: Conv1d(k=1) + folded BN + LeakyReLU(0.2)
    h1 = jnp.dot(w1_ref[...], x, preferred_element_type=jnp.float32)   # (256, tn)
    h1 = h1 + b1_ref[...]                                               # +(256, 1)
    h1 = jnp.maximum(h1, 0.2 * h1).astype(jnp.bfloat16)

    # Layer 2: Conv1d(k=1) + folded BN + LeakyReLU(0.2)
    h2 = jnp.dot(w2_ref[...], h1, preferred_element_type=jnp.float32)  # (128, tn)
    h2 = h2 + b2_ref[...]
    h2 = jnp.maximum(h2, 0.2 * h2).astype(jnp.bfloat16)

    # TODO(synk): Dropout2d skipped (eval mode => identity); training-mode
    # channel dropout is not implemented.

    # Layer 3: final Conv1d(128 -> 3, k=1). Weight rows padded 3 -> 8 for a
    # clean MXU tile; only the 3 real channels are stored (lane-dense on tn).
    out = jnp.dot(w3_ref[...], h2, preferred_element_type=jnp.float32)  # (8, tn)
    o_ref[0] = (out[:3] + b3_ref[...]).astype(o_ref.dtype)              # (3, tn)


def _pick_tile_n(N, cap=2048):
    """Tile along N: multiple of 128, <= cap, >= 2 tiles when N allows it
    (so B * n_tiles >= 4 and even for v7x megacore).  cap=2048 keeps per-step
    VMEM ~7 MiB — inside every generation's scoped default (v5e 16 MiB,
    v6e/v7x 32 MiB)."""
    if N <= 128:
        return N                       # single block == full (small) axis
    t = min(cap, (N // 2) // 128 * 128)
    return max(t, 128)


def offset_branch(x_bcn, params, *, tile_n_cap=2048):
    """x_bcn: (B, C_in, N) float32 (PyTorch NCW). Returns (B, 3, N) float32."""
    B, C_in, N = x_bcn.shape
    w1, b1, w2, b2, w3p, b3 = params
    C1 = w1.shape[0]        # 256
    C2 = w2.shape[0]        # 128
    C3p = w3p.shape[0]      # 8 (3 real rows + 5 zero pad, matmul-only)

    tile_n = _pick_tile_n(N, tile_n_cap)
    grid = (B, pl.cdiv(N, tile_n))      # edge block handles N % tile_n != 0
    const = lambda shape: pl.BlockSpec(shape, lambda b, j: (0, 0))

    return pl.pallas_call(
        _offset_branch_kernel,
        out_shape=jax.ShapeDtypeStruct((B, 3, N), jnp.float32),
        grid_spec=pltpu.PrefetchScalarGridSpec(
            num_scalar_prefetch=0,
            grid=grid,
            in_specs=[
                pl.BlockSpec((1, C_in, tile_n), lambda b, j: (b, 0, j)),
                const((C1, C_in)), const((C1, 1)),
                const((C2, C1)), const((C2, 1)),
                const((C3p, C2)), const((3, 1)),
            ],
            out_specs=pl.BlockSpec((1, 3, tile_n), lambda b, j: (b, 0, j)),
        ),
        compiler_params=pltpu.CompilerParams(
            dimension_semantics=("parallel", "parallel")),
    )(x_bcn, w1, b1, w2, b2, w3p, b3)


def make_params(key, c_in):
    """Deterministic synthetic parameters; BN folded into conv weight/bias,
    weights cast to bf16 and kept in (C_out, C_in) layout for the
    channel-major kernel; final conv weight zero-padded 3 -> 8 rows."""
    ks = jax.random.split(key, 8)

    def conv(kw, kb, cin, cout):
        w = jax.random.normal(kw, (cout, cin), jnp.float32) / jnp.sqrt(cin)
        b = jax.random.normal(kb, (cout,), jnp.float32) * 0.1
        return w, b

    def bn(k, c):
        kg, kb, km, kv = jax.random.split(k, 4)
        gamma = 1.0 + 0.1 * jax.random.normal(kg, (c,), jnp.float32)
        beta = 0.1 * jax.random.normal(kb, (c,), jnp.float32)
        mean = 0.1 * jax.random.normal(km, (c,), jnp.float32)
        var = jnp.abs(jax.random.normal(kv, (c,), jnp.float32)) + 0.5
        return gamma, beta, mean, var

    w1, b1 = conv(ks[0], ks[1], c_in, 256)
    bn1 = bn(ks[2], 256)
    w2, b2 = conv(ks[3], ks[4], 256, 128)
    bn2 = bn(ks[5], 128)
    w3, b3 = conv(ks[6], ks[7], 128, 3)

    eps = 1e-5
    g1, be1, m1, v1 = bn1
    g2, be2, m2, v2 = bn2
    s1 = g1 / jnp.sqrt(v1 + eps)
    s2 = g2 / jnp.sqrt(v2 + eps)
    # Fold BN: y = s*(Wx + b - mean) + beta  =>  W' = s[:,None]*W ; b' = s*(b-mean)+beta
    w1f = (s1[:, None] * w1).astype(jnp.bfloat16)          # (256, C_in) bf16
    b1f = (s1 * (b1 - m1) + be1)[:, None]                  # (256, 1) f32
    w2f = (s2[:, None] * w2).astype(jnp.bfloat16)          # (128, 256) bf16
    b2f = (s2 * (b2 - m2) + be2)[:, None]                  # (128, 1) f32
    # Pad 3 -> 8 rows for the MXU; don't widen further (v6e: no extra MXU work).
    w3p = jnp.zeros((8, w3.shape[1]), jnp.float32).at[:3].set(w3).astype(jnp.bfloat16)
    b3f = b3[:, None]                                      # (3, 1) f32

    raw = dict(w1=w1, b1=b1, bn1=bn1, w2=w2, b2=b2, bn2=bn2, w3=w3, b3=b3)
    return (w1f, b1f, w2f, b2f, w3p, b3f), raw


def reference(x_bcn, raw):
    """Pure-JAX f32 reference mirroring the PyTorch forward (NCW layout)."""
    eps = 1e-5

    def conv1(x, w, b):                    # x: (B, Cin, N)
        return jnp.einsum('oc,bcn->bon', w, x) + b[None, :, None]

    def bnorm(x, p):
        g, be, m, v = p
        return (x - m[None, :, None]) / jnp.sqrt(v[None, :, None] + eps) \
               * g[None, :, None] + be[None, :, None]

    lrelu = lambda t: jnp.where(t > 0, t, 0.2 * t)
    h = lrelu(bnorm(conv1(x_bcn, raw['w1'], raw['b1']), raw['bn1']))
    h = lrelu(bnorm(conv1(h, raw['w2'], raw['b2']), raw['bn2']))
    return conv1(h, raw['w3'], raw['b3'])   # (B, 3, N)


if __name__ == "__main__":
    # args.emb_dims = 64, args.n_edgeconvs_backbone = 1  =>  C_in = 128
    B, C_in, N = 2, 128, 1024
    key = jax.random.PRNGKey(0)
    kx, kp, kx2 = jax.random.split(key, 3)

    params, raw = make_params(kp, C_in)
    fwd = jax.jit(offset_branch)

    # Main test: PyTorch NCW input consumed directly, no wrapper pre-passes.
    x = jax.random.normal(kx, (B, C_in, N), jnp.float32)
    y = jax.block_until_ready(fwd(x, params))
    y_ref = reference(x, raw)
    assert y.shape == (B, 3, N)
    err = float(jnp.max(jnp.abs(y - y_ref)))
    assert jnp.allclose(y, y_ref, rtol=2e-2, atol=2e-2), \
        f"mismatch vs reference (max abs err {err})"

    # Edge-block test: N not divisible by the tile (no jnp.pad anywhere);
    # partial last block, OOB writes dropped by Pallas.
    N2 = 1000
    x2 = jax.random.normal(kx2, (B, C_in, N2), jnp.float32)
    y2 = jax.block_until_ready(fwd(x2, params))
    y2_ref = reference(x2, raw)
    assert y2.shape == (B, 3, N2)
    err2 = float(jnp.max(jnp.abs(y2 - y2_ref)))
    assert jnp.allclose(y2, y2_ref, rtol=2e-2, atol=2e-2), \
        f"edge-block mismatch vs reference (max abs err {err2})"

    print("KERNEL_OK")
</pallas_src>

<mosaic_0001>
module attributes {stable_mosaic.version = 11 : i64} {
  func.func @_offset_branch_kernel(%arg0: i32, %arg1: i32, %arg2: memref<1x128x512xf32, #tpu.memory_space<vmem>>, %arg3: memref<256x128xbf16, #tpu.memory_space<vmem>>, %arg4: memref<256x1xf32, #tpu.memory_space<vmem>>, %arg5: memref<128x256xbf16, #tpu.memory_space<vmem>>, %arg6: memref<128x1xf32, #tpu.memory_space<vmem>>, %arg7: memref<8x128xbf16, #tpu.memory_space<vmem>>, %arg8: memref<3x1xf32, #tpu.memory_space<vmem>>, %arg9: memref<1x3x512xf32, #tpu.memory_space<vmem>>) attributes {dimension_semantics = [#tpu.dimension_semantics<parallel>, #tpu.dimension_semantics<parallel>], iteration_bounds = array<i64: 2, 2>, scalar_prefetch = 0 : i64, scratch_operands = 0 : i64, tpu.core_type = #tpu.core_type<tc>, window_params = [{transform_indices = @transform_0, window_bounds = array<i64: 1, 128, 512>}, {pipeline_mode = #tpu.pipeline_mode<synchronous>, transform_indices = @transform_1, window_bounds = array<i64: 256, 128>}, {pipeline_mode = #tpu.pipeline_mode<synchronous>, transform_indices = @transform_2, window_bounds = array<i64: 256, 1>}, {pipeline_mode = #tpu.pipeline_mode<synchronous>, transform_indices = @transform_3, window_bounds = array<i64: 128, 256>}, {pipeline_mode = #tpu.pipeline_mode<synchronous>, transform_indices = @transform_4, window_bounds = array<i64: 128, 1>}, {pipeline_mode = #tpu.pipeline_mode<synchronous>, transform_indices = @transform_5, window_bounds = array<i64: 8, 128>}, {pipeline_mode = #tpu.pipeline_mode<synchronous>, transform_indices = @transform_6, window_bounds = array<i64: 3, 1>}, {transform_indices = @transform_7, window_bounds = array<i64: 1, 3, 512>}]} {
    %c0 = arith.constant 0 : index
    %c0_0 = arith.constant 0 : index
    %c0_1 = arith.constant 0 : index
    %0 = vector.load %arg2[%c0, %c0_0, %c0_1] : memref<1x128x512xf32, #tpu.memory_space<vmem>>, vector<1x128x512xf32>
    %1 = vector.shape_cast %0 : vector<1x128x512xf32> to vector<128x512xf32>
    %2 = arith.truncf %1 : vector<128x512xf32> to vector<128x512xbf16>
    %c0_2 = arith.constant 0 : index
    %c0_3 = arith.constant 0 : index
    %3 = vector.load %arg3[%c0_2, %c0_3] : memref<256x128xbf16, #tpu.memory_space<vmem>>, vector<256x128xbf16>
    %cst = arith.constant dense<0.000000e+00> : vector<256x512xf32>
    %4 = tpu.matmul %3, %2, %cst {dimension_numbers = #tpu.dot_dimension_numbers<[1], [0], [0], [1], [0, 0, 1, 1], [], []>} : vector<256x128xbf16>, vector<128x512xbf16>, vector<256x512xf32> -> vector<256x512xf32>
    %c0_4 = arith.constant 0 : index
    %c0_5 = arith.constant 0 : index
    %5 = vector.load %arg4[%c0_4, %c0_5] : memref<256x1xf32, #tpu.memory_space<vmem>>, vector<256x1xf32>
    %6 = vector.broadcast %5 : vector<256x1xf32> to vector<256x512xf32>
    %7 = arith.addf %4, %6 : vector<256x512xf32>
    %cst_6 = arith.constant 2.000000e-01 : f32
    %8 = vector.broadcast %cst_6 : f32 to vector<256x512xf32>
    %9 = arith.mulf %8, %7 : vector<256x512xf32>
    %10 = arith.maximumf %7, %9 : vector<256x512xf32>
    %11 = arith.truncf %10 : vector<256x512xf32> to vector<256x512xbf16>
    %c0_7 = arith.constant 0 : index
    %c0_8 = arith.constant 0 : index
    %12 = vector.load %arg5[%c0_7, %c0_8] : memref<128x256xbf16, #tpu.memory_space<vmem>>, vector<128x256xbf16>
    %cst_9 = arith.constant dense<0.000000e+00> : vector<128x512xf32>
    %13 = tpu.matmul %12, %11, %cst_9 {dimension_numbers = #tpu.dot_dimension_numbers<[1], [0], [0], [1], [0, 0, 1, 1], [], []>} : vector<128x256xbf16>, vector<256x512xbf16>, vector<128x512xf32> -> vector<128x512xf32>
    %c0_10 = arith.constant 0 : index
    %c0_11 = arith.constant 0 : index
    %14 = vector.load %arg6[%c0_10, %c0_11] : memref<128x1xf32, #tpu.memory_space<vmem>>, vector<128x1xf32>
    %15 = vector.broadcast %14 : vector<128x1xf32> to vector<128x512xf32>
    %16 = arith.addf %13, %15 : vector<128x512xf32>
    %cst_12 = arith.constant 2.000000e-01 : f32
    %17 = vector.broadcast %cst_12 : f32 to vector<128x512xf32>
    %18 = arith.mulf %17, %16 : vector<128x512xf32>
    %19 = arith.maximumf %16, %18 : vector<128x512xf32>
    %20 = arith.truncf %19 : vector<128x512xf32> to vector<128x512xbf16>
    %c0_13 = arith.constant 0 : index
    %c0_14 = arith.constant 0 : index
    %21 = vector.load %arg7[%c0_13, %c0_14] : memref<8x128xbf16, #tpu.memory_space<vmem>>, vector<8x128xbf16>
    %cst_15 = arith.constant dense<0.000000e+00> : vector<8x512xf32>
    %22 = tpu.matmul %21, %20, %cst_15 {dimension_numbers = #tpu.dot_dimension_numbers<[1], [0], [0], [1], [0, 0, 1, 1], [], []>} : vector<8x128xbf16>, vector<128x512xbf16>, vector<8x512xf32> -> vector<8x512xf32>
    %23 = vector.extract_strided_slice %22 {offsets = [0, 0], sizes = [3, 512], strides = [1, 1]} : vector<8x512xf32> to vector<3x512xf32>
    %c0_16 = arith.constant 0 : index
    %c0_17 = arith.constant 0 : index
    %24 = vector.load %arg8[%c0_16, %c0_17] : memref<3x1xf32, #tpu.memory_space<vmem>>, vector<3x1xf32>
    %25 = vector.broadcast %24 : vector<3x1xf32> to vector<3x512xf32>
    %26 = arith.addf %23, %25 : vector<3x512xf32>
    %c0_18 = arith.constant 0 : index
    %c0_19 = arith.constant 0 : index
    %c0_20 = arith.constant 0 : index
    %27 = vector.load %arg9[%c0_18, %c0_19, %c0_20] : memref<1x3x512xf32, #tpu.memory_space<vmem>>, vector<1x3x512xf32>
    %28 = vector.shape_cast %27 : vector<1x3x512xf32> to vector<3x512xf32>
    %29 = vector.shape_cast %26 : vector<3x512xf32> to vector<1x3x512xf32>
    tpu.vector_store %arg9[%c0_18, %c0_19, %c0_20], %29 {strides = array<i32>} : memref<1x3x512xf32, #tpu.memory_space<vmem>>, vector<1x3x512xf32>,
    return
  }
  func.func @transform_0(%arg0: i32, %arg1: i32) -> (i32, i32, i32) {
    %c0_i32 = arith.constant 0 : i32
    %c0_i32_0 = arith.constant 0 : i32
    return %arg0, %c0_i32, %arg1 : i32, i32, i32
  }
  func.func @transform_1(%arg0: i32, %arg1: i32) -> (i32, i32) {
    %c0_i32 = arith.constant 0 : i32
    %c0_i32_0 = arith.constant 0 : i32
    %c0_i32_1 = arith.constant 0 : i32
    return %c0_i32, %c0_i32_0 : i32, i32
  }
  func.func @transform_2(%arg0: i32, %arg1: i32) -> (i32, i32) {
    %c0_i32 = arith.constant 0 : i32
    %c0_i32_0 = arith.constant 0 : i32
    %c0_i32_1 = arith.constant 0 : i32
    return %c0_i32, %c0_i32_0 : i32, i32
  }
  func.func @transform_3(%arg0: i32, %arg1: i32) -> (i32, i32) {
    %c0_i32 = arith.constant 0 : i32
    %c0_i32_0 = arith.constant 0 : i32
    %c0_i32_1 = arith.constant 0 : i32
    return %c0_i32, %c0_i32_0 : i32, i32
  }
  func.func @transform_4(%arg0: i32, %arg1: i32) -> (i32, i32) {
    %c0_i32 = arith.constant 0 : i32
    %c0_i32_0 = arith.constant 0 : i32
    %c0_i32_1 = arith.constant 0 : i32
    return %c0_i32, %c0_i32_0 : i32, i32
  }
  func.func @transform_5(%arg0: i32, %arg1: i32) -> (i32, i32) {
    %c0_i32 = arith.constant 0 : i32
    %c0_i32_0 = arith.constant 0 : i32
    %c0_i32_1 = arith.constant 0 : i32
    return %c0_i32, %c0_i32_0 : i32, i32
  }
  func.func @transform_6(%arg0: i32, %arg1: i32) -> (i32, i32) {
    %c0_i32 = arith.constant 0 : i32
    %c0_i32_0 = arith.constant 0 : i32
    %c0_i32_1 = arith.constant 0 : i32
    return %c0_i32, %c0_i32_0 : i32, i32
  }
  func.func @transform_7(%arg0: i32, %arg1: i32) -> (i32, i32, i32) {
    %c0_i32 = arith.constant 0 : i32
    %c0_i32_0 = arith.constant 0 : i32
    return %arg0, %c0_i32, %arg1 : i32, i32, i32
  }
}

</mosaic_0001>

<bundles_post_ra>
// kernel: offset_branch.1
= control target key start
LH: loop header
LB: loop body
LE: loop exit
PB: predicated region body
PF: predicated region fallthrough
CT: control target
= control target key end

     0   :  { %s4213_s0 = inlined_call_operand.hbm [shape: f32[2,128,1024], index: 0, kind: input, shape index: {}]   ;;  %s4214_s1 = inlined_call_operand.vmem [shape: bf16[256,128], index: 1, kind: input, shape index: {}]   ;;  %s4215_s2 = inlined_call_operand.vmem [shape: f32[256,1], index: 2, kind: input, shape index: {}]   ;;  %s4216_s3 = inlined_call_operand.vmem [shape: bf16[128,256], index: 3, kind: input, shape index: {}]   ;;  %s4217_s4 = inlined_call_operand.vmem [shape: f32[128,1], index: 4, kind: input, shape index: {}]   ;;  %s4218_s5 = inlined_call_operand.vmem [shape: bf16[8,128], index: 5, kind: input, shape index: {}]   ;;  %s4219_s6 = inlined_call_operand.vmem [shape: f32[3,1], index: 6, kind: input, shape index: {}]   ;;  %s4220_s7 = inlined_call_operand.vmem [shape: f32[2,3,1024], index: 7, kind: output, shape index: {}]  }
   0x1   :  { %4265 = sst [smem:[#allocation52_spill]] %s4220_s7 }
   0x2   :  { %12 = vsyncpa [#allocation3], 0 }
   0x3   :  { %14 = vsyncpa [#allocation3 + $0x1], 0  ;;  %s2734_s24 = smov 0   ;;  %s2736_s25 = smov 0  }
   0x4   :  { %s2738_s26 = smov 0   ;;  %s2740_s27 = smov 0  }
   0x5   :  { %s2742_s28 = smov 0   ;;  %s2744_s29 = smov 0  }
   0x6   :  { %s2746_s30 = smov 0   ;;  %s2748_s8 = smov 0  }
   0x7 LB: > { %4266 = sst [smem:[#allocation5_spill]] %s2676_s28  ;;  %s2339_s9 = sadd.s32 4294967295, %s2688_s8   ;;  %s2688_s8 = sphi %s2748_s8, %s20_s8   ;;  %s2684_s30 = sphi %s2746_s30, %s4423_s30   ;;  %s2680_s29 = sphi %s2744_s29, %s4417_s29   ;;  %s2676_s28 = sphi %s2742_s28, %s4422_s28   ;;  %s2672_s27 = sphi %s2740_s27, %s4416_s27   ;;  %s2668_s26 = sphi %s2738_s26, %s4421_s26   ;;  %s2664_s25 = sphi %s2736_s25, %s4420_s25   ;;  %s2660_s24 = sphi %s2734_s24, %s4419_s24  }
   0x8   : > { %4267 = sst [smem:[#allocation6_spill]] %s2680_s29  ;;  %s29_s10 = sadd.s32 1, %s2680_s29 }
   0x9   : > { %p30_p0 = scmp.ge.s32.totalorder %s29_s10, 2  ;;  %s32_s11 = sadd.s32 1, %s2684_s30 }
   0xa   : > { %s41_s12 = sadd.s32 1, %s2668_s26  ;;  %p48_p1 = scmp.ne.s32.totalorder %s2668_s26, %s2664_s25 }
   0xb   : > { %s4425_s10 = smov (%p30_p0, %s29_s10), 0  ;;  %s4427_s11 = smov (!%p30_p0, %s32_s11), %s2684_s30 }
   0xc   : > { %4268 = sst [smem:[#allocation7_spill]] %s4425_s10  ;;  %s37_s13 = ssub.s32 %s2680_s29, %s4425_s10 }
   0xd   : > { %p49_p2 = scmp.eq.s32.totalorder %s2688_s8, 0  ;;  %p34_p3 = scmp.ge.s32.totalorder %s4427_s11, 2 }
   0xe   : > { %p54_p4 = scmp.ne.s32.totalorder %s2664_s25, %s2660_s24  ;;  %p55_p6 = scmp.eq.s32.totalorder %s2339_s9, 0 }
   0xf   : > { %p2785_p5 = por %p49_p2, %p48_p1  ;;  %s4429_s11 = smov (%p34_p3, %s4427_s11), 0 }
  0x10   : > { %4270 = sst [smem:[#allocation8_spill]] %s4429_s11  ;;  %p2791_p7 = por %p55_p6, %p54_p4 }
  0x11   : > { %s36_s16 = ssub.s32 %s2684_s30, %s4429_s11  ;;  %p2520_p8 = scmp.lt.s32.totalorder %s2688_s8, 4 }
  0x12   : > { %s38_s17 = sor.u32 %s37_s13, %s36_s16  ;;  %s250_s18 = sand.u32 1, %s2668_s26  }
  0x13   : > { %p39_p9 = scmp.eq.s32.totalorder %s38_s17, 0  ;;  %s2343_s19 = sshll.u32 %s250_s18, 9 }
  0x14   : > { %s2344_s20 = sshll.u32 %s2680_s29, 2  ;;  %s2345_s22 = sshll.u32 %s2684_s30, 7 }
  0x15   : > { %s2801_s21 = scalar_select %p39_p9, %s2668_s26, %s41_s12  }
  0x16   : > { %s259_s23 = sadd.s32 %s2345_s22, %s2344_s20  ;;  %s254_s24 = scalar_lea.vmem [#allocation2], %s2343_s19 }
  0x17   : > { %s264_s9 = sshll.u32 %s254_s24, 4  ;;  %s2346_s10 = sshll.u32 %s259_s23, 3  ;;  %s265_s9 = int_to_ptr.vmem [resolvable:$true] %s264_s9 }
  0x18   : > { %s261_s11 = scalar_lea.hbm %s4213_s0, %s2346_s10  ;;  %p2517_p10 = pnand %p2520_p8, %p2785_p5 }
  0x19   : > { %s262_s13 = sshll.u32 %s261_s11, 4  ;;  %s251_s16 = scalar_lea.sflag [#allocation3], %s250_s18  ;;  %s263_s13 = int_to_ptr.hbm [resolvable:$true] %s262_s13 }
  0x1a   : > { %s2690_s12 = smov 1024   ;;  %s2691_s17 = smov 512  }
  0x1b   : > { %s2692_s29 = smov 32   ;;  %p2347_p11 = scmp.ge.s32.totalorder %s2688_s8, 1 }
  0x1c   : > { %2519 = dma.hbm_to_vmem [thread:$0]  (!%p2517_p10), %s263_s13, 8192, %s265_s9, %s251_s16, %s2690_s12, %s2691_s17, %s2692_s29  }
  0x1d   : > { %p272_p12 = scmp.lt.s32.totalorder %s2688_s8, 5 }
  0x1f   : > { %p273_p13 = pnand %p2347_p11, %p272_p12 }
  0x21   : > { %276 = sbr.rel (%p273_p13) target bundleno = 1051 (0x41b), region = 48 }
  0x26   : > { %s278_s19 = sand.u32 1, %s2664_s25  }
  0x27   : > { %s2348_s20 = sshll.u32 %s278_s19, 9  ;;  %s279_s7 = scalar_lea.sflag [#allocation3], %s278_s19 }
  0x28   : > { %s2814_s28 = scalar_lea.vmem [#allocation2], %s2348_s20 }
  0x29   : > { %2655 = dma.done.wait (%p2791_p7), %s279_s7, 8192  }
  0x2a   : > { %2657 = vsyncadd (%p2791_p7), %s279_s7, 4294959104  ;;  %v2693_v0 = vmov 0   ;;  %v487_v1 = vld [vmem:[%s4215_s2 + $0xf0] sm:$0xff]  ;;  %v385_v3 = vld [vmem:[%s2814_s28 + $0x1c0] sm:$0xff]  ;;  %s4414_s7 = sld [smem:[#allocation5_spill]]  ;;  %s2349_s29 = sshll.u32 %s2672_s27, 2 }
  0x2b   : > { %2590 = vset.pattern.permute.xlu1 %v2693_v0  ;;  %2589 = vset.pattern.permute.xlu0 %v2693_v0  ;;  %v471_v2 = vld [vmem:[%s4215_s2 + $0x70] sm:$0xff]  ;;  %v389_v4 = vld [vmem:[%s2814_s28 + $0x1e0] sm:$0xff]  ;;  %v386_v5 = vld [vmem:[%s2814_s28 + $0x1c8] sm:$0xff]  ;;  %p322_p1 = scmp.lt.s32.totalorder %s2349_s29, 7  ;;  %vm2234_vm0 = vcmask 1043456   ;;  %s4415_s18 = sld [smem:[#allocation52_spill]] }
  0x2c   : > { %2591 = vset.pattern.permute.xlu2 %v2693_v0  ;;  %641 = vperm.xlu1 %2590, %v487_v1   ;;  %v390_v6 = vld [vmem:[%s2814_s28 + $0x1e8] sm:$0xff]  ;;  %v421_v7 = vpack.c.bf16 %v389_v4, %v385_v3  ;;  %v387_v9 = vld [vmem:[%s2814_s28 + $0x1d0] sm:$0xff]  ;;  %v388_v11 = vld [vmem:[%s2814_s28 + $0x1d8] sm:$0xff] }
  0x2d   : > { %561 = vperm.xlu0 %2589, %v471_v2   ;;  %v422_v8 = vpack.c.bf16 %v390_v6, %v386_v5  ;;  %v391_v10 = vld [vmem:[%s2814_s28 + $0x1f0] sm:$0xff]  ;;  %v392_v13 = vld [vmem:[%s2814_s28 + $0x1f8] sm:$0xff]  ;;  %v469_v14 = vld [vmem:[%s4215_s2 + $0x60] sm:$0xff]  ;;  %s4433_s29 = smov (!%p322_p1, %s2349_s29), 7 }
  0x2e   : > { %v423_v12 = vpack.c.bf16 %v391_v10, %v387_v9  ;;  %v377_v15 = vld [vmem:[%s2814_s28 + $0x180] sm:$0xff]  ;;  %745 = vmatpush.bf16.msra.mxu0 %v421_v7  ;;  %v424_v16 = vpack.c.bf16 %v392_v13, %v388_v11  ;;  %v378_v18 = vld [vmem:[%s2814_s28 + $0x188] sm:$0xff]  ;;  %551 = vperm.xlu2 %2591, %v469_v14   ;;  %v379_v22 = vld [vmem:[%s2814_s28 + $0x190] sm:$0xff] }
  0x2f   : > { %834 = vmatpush.bf16.msra.mxu1 %v422_v8  ;;  %v381_v17 = vld [vmem:[%s2814_s28 + $0x1a0] sm:$0xff]  ;;  %v382_v19 = vld [vmem:[%s2814_s28 + $0x1a8] sm:$0xff]  ;;  %v383_v23 = vld [vmem:[%s2814_s28 + $0x1b0] sm:$0xff] }
  0x30   : > { %923 = vmatpush.bf16.msra.mxu2 %v423_v12  ;;  %v417_v20 = vpack.c.bf16 %v381_v17, %v377_v15  ;;  %v418_v21 = vpack.c.bf16 %v382_v19, %v378_v18  ;;  %v380_v24 = vld [vmem:[%s2814_s28 + $0x198] sm:$0xff]  ;;  %1012 = vmatpush.bf16.msra.mxu3 %v424_v16  ;;  %v419_v25 = vpack.c.bf16 %v383_v23, %v379_v22  ;;  %v369_v30 = vld [vmem:[%s2814_s28 + $0x140] sm:$0xff]  ;;  %v370_v32 = vld [vmem:[%s2814_s28 + $0x148] sm:$0xff]  ;;  %p320_p0 = scmp.lt.s32.totalorder %s4414_s7, 1 }
  0x31   : > { %v384_v26 = vld [vmem:[%s2814_s28 + $0x1b8] sm:$0xff]  ;;  %v373_v31 = vld [vmem:[%s2814_s28 + $0x160] sm:$0xff]  ;;  %v374_v34 = vld [vmem:[%s2814_s28 + $0x168] sm:$0xff] }
  0x32   : > { %v488_v27 = vld [vmem:[%s4215_s2 + $0xf8] sm:$0xff]  ;;  %v420_v29 = vpack.c.bf16 %v384_v26, %v380_v24  ;;  %746 = vmatpush.bf16.msra.mxu0 %v417_v20  ;;  %v413_v33 = vpack.c.bf16 %v373_v31, %v369_v30  ;;  %v371_v35 = vld [vmem:[%s2814_s28 + $0x150] sm:$0xff]  ;;  %v414_v37 = vpack.c.bf16 %v374_v34, %v370_v32  ;;  %v470_v41 = vld [vmem:[%s4215_s2 + $0x68] sm:$0xff]  ;;  %s4431_s7 = smov (!%p320_p0, %s4414_s7), 1 }
  0x33   : > { %v472_v28 = vld [vmem:[%s4215_s2 + $0x78] sm:$0xff]  ;;  %835 = vmatpush.bf16.msra.mxu1 %v418_v21  ;;  %v375_v36 = vld [vmem:[%s2814_s28 + $0x170] sm:$0xff]  ;;  %v361_v43 = vld [vmem:[%s2814_s28 + $0x100] sm:$0xff]  ;;  %s2350_s10 = sshll.u32 %s4431_s7, 3 }
  0x34   : > { %924 = vmatpush.bf16.msra.mxu2 %v419_v25  ;;  %646 = vperm.xlu1 %2590, %v488_v27   ;;  %v415_v38 = vpack.c.bf16 %v375_v36, %v371_v35  ;;  %v372_v39 = vld [vmem:[%s2814_s28 + $0x158] sm:$0xff]  ;;  %v365_v44 = vld [vmem:[%s2814_s28 + $0x120] sm:$0xff]  ;;  %v362_v45 = vld [vmem:[%s2814_s28 + $0x108] sm:$0xff]  ;;  %s325_s11 = sadd.s32 %s2350_s10, %s4433_s29 }
  0x35   : > { %v376_v40 = vld [vmem:[%s2814_s28 + $0x178] sm:$0xff]  ;;  %1013 = vmatpush.bf16.msra.mxu3 %v420_v29  ;;  %566 = vperm.xlu0 %2589, %v472_v28   ;;  %v366_v46 = vld [vmem:[%s2814_s28 + $0x128] sm:$0xff]  ;;  %v363_v47 = vld [vmem:[%s2814_s28 + $0x110] sm:$0xff]  ;;  %v409_v49 = vpack.c.bf16 %v365_v44, %v361_v43  ;;  %s2351_s27 = sshll.u32 %s325_s11, 2 }
  0x36   : > { %v416_v42 = vpack.c.bf16 %v376_v40, %v372_v39  ;;  %v367_v48 = vld [vmem:[%s2814_s28 + $0x130] sm:$0xff]  ;;  %747 = vmatpush.bf16.msra.mxu0 %v413_v33  ;;  %v410_v50 = vpack.c.bf16 %v366_v46, %v362_v45  ;;  %v364_v51 = vld [vmem:[%s2814_s28 + $0x118] sm:$0xff]  ;;  %v486_v53 = vld [vmem:[%s4215_s2 + $0xe8] sm:$0xff]  ;;  %556 = vperm.xlu2 %2591, %v470_v41   ;;  %s327_s22 = scalar_lea.vmem %s4415_s18, %s2351_s27 }
  0x37   : > { %836 = vmatpush.bf16.msra.mxu1 %v414_v37  ;;  %v368_v52 = vld [vmem:[%s2814_s28 + $0x138] sm:$0xff]  ;;  %v411_v54 = vpack.c.bf16 %v367_v48, %v363_v47  ;;  %v485_v55 = vld [vmem:[%s4215_s2 + $0xe0] sm:$0xff]  ;;  %v354_v59 = vld [vmem:[%s2814_s28 + $0xc8] sm:$0xff] }
  0x38   : > { %925 = vmatpush.bf16.msra.mxu2 %v415_v38  ;;  %v353_v56 = vld [vmem:[%s2814_s28 + $0xc0] sm:$0xff]  ;;  %v412_v58 = vpack.c.bf16 %v368_v52, %v364_v51  ;;  %v358_v60 = vld [vmem:[%s2814_s28 + $0xe8] sm:$0xff]  ;;  %v355_v61 = vld [vmem:[%s2814_s28 + $0xd0] sm:$0xff] }
  0x39   : > { %v357_v57 = vld [vmem:[%s2814_s28 + $0xe0] sm:$0xff]  ;;  %1014 = vmatpush.bf16.msra.mxu3 %v416_v42  ;;  %v359_v62 = vld [vmem:[%s2814_s28 + $0xf0] sm:$0xff]  ;;  %v356_v63 = vld [vmem:[%s2814_s28 + $0xd8] sm:$0xff]  ;;  %v406_v2 = vpack.c.bf16 %v358_v60, %v354_v59 }
  0x3a   : > { %v360_v0 = vld [vmem:[%s2814_s28 + $0xf8] sm:$0xff]  ;;  %748 = vmatpush.bf16.msra.mxu0 %v409_v49  ;;  %v405_v1 = vpack.c.bf16 %v357_v57, %v353_v56  ;;  %v345_v3 = vld [vmem:[%s2814_s28 + $0x80] sm:$0xff]  ;;  %v407_v4 = vpack.c.bf16 %v359_v62, %v355_v61  ;;  %v346_v6 = vld [vmem:[%s2814_s28 + $0x88] sm:$0xff] }
  0x3b   : > { %837 = vmatpush.bf16.msra.mxu1 %v410_v50  ;;  %v349_v5 = vld [vmem:[%s2814_s28 + $0xa0] sm:$0xff]  ;;  %v350_v7 = vld [vmem:[%s2814_s28 + $0xa8] sm:$0xff]  ;;  %v408_v8 = vpack.c.bf16 %v360_v0, %v356_v63  ;;  %v467_v9 = vld [vmem:[%s4215_s2 + $0x50] sm:$0xff] }
  0x3c   : > { %926 = vmatpush.bf16.msra.mxu2 %v411_v54  ;;  %636 = vperm.xlu1 %2590, %v486_v53   ;;  %v347_v10 = vld [vmem:[%s2814_s28 + $0x90] sm:$0xff]  ;;  %v348_v12 = vld [vmem:[%s2814_s28 + $0x98] sm:$0xff]  ;;  %v401_v14 = vpack.c.bf16 %v349_v5, %v345_v3  ;;  %v402_v15 = vpack.c.bf16 %v350_v7, %v346_v6  ;;  %v337_v16 = vld [vmem:[%s2814_s28 + $0x40] sm:$0xff] }
  0x3d   : > { %1015 = vmatpush.bf16.msra.mxu3 %v412_v58  ;;  %631 = vperm.xlu0 %2589, %v485_v55   ;;  %v351_v11 = vld [vmem:[%s2814_s28 + $0xb0] sm:$0xff]  ;;  %v352_v13 = vld [vmem:[%s2814_s28 + $0xb8] sm:$0xff]  ;;  %v341_v18 = vld [vmem:[%s2814_s28 + $0x60] sm:$0xff] }
  0x3e   : > { %749 = vmatpush.bf16.msra.mxu0 %v405_v1  ;;  %541 = vperm.xlu2 %2591, %v467_v9   ;;  %v403_v17 = vpack.c.bf16 %v351_v11, %v347_v10  ;;  %v338_v19 = vld [vmem:[%s2814_s28 + $0x48] sm:$0xff]  ;;  %v404_v21 = vpack.c.bf16 %v352_v13, %v348_v12  ;;  %v483_v22 = vld [vmem:[%s4215_s2 + $0xd0] sm:$0xff]  ;;  %v468_v25 = vld [vmem:[%s4215_s2 + $0x58] sm:$0xff]  ;;  %v397_v28 = vpack.c.bf16 %v341_v18, %v337_v16 }
  0x3f   : > { %838 = vmatpush.bf16.msra.mxu1 %v406_v2  ;;  %v342_v20 = vld [vmem:[%s2814_s28 + $0x68] sm:$0xff]  ;;  %v339_v23 = vld [vmem:[%s2814_s28 + $0x50] sm:$0xff]  ;;  %v340_v26 = vld [vmem:[%s2814_s28 + $0x58] sm:$0xff] }
  0x40   : > { %927 = vmatpush.bf16.msra.mxu2 %v407_v4  ;;  %v343_v24 = vld [vmem:[%s2814_s28 + $0x70] sm:$0xff]  ;;  %v344_v27 = vld [vmem:[%s2814_s28 + $0x78] sm:$0xff]  ;;  %v398_v29 = vpack.c.bf16 %v342_v20, %v338_v19  ;;  %v329_v30 = vld [vmem:[%s2814_s28] sm:$0xff] }
  0x41   : > { %1016 = vmatpush.bf16.msra.mxu3 %v408_v8  ;;  %v399_v31 = vpack.c.bf16 %v343_v24, %v339_v23  ;;  %v333_v32 = vld [vmem:[%s2814_s28 + $0x20] sm:$0xff]  ;;  %v330_v33 = vld [vmem:[%s2814_s28 + $0x8] sm:$0xff]  ;;  %v400_v35 = vpack.c.bf16 %v344_v27, %v340_v26  ;;  %v484_v36 = vld [vmem:[%s4215_s2 + $0xd8] sm:$0xff] }
  0x42   : > { %750 = vmatpush.bf16.msra.mxu0 %v401_v14  ;;  %v334_v34 = vld [vmem:[%s2814_s28 + $0x28] sm:$0xff]  ;;  %v331_v37 = vld [vmem:[%s2814_s28 + $0x10] sm:$0xff]  ;;  %v332_v39 = vld [vmem:[%s2814_s28 + $0x18] sm:$0xff]  ;;  %v393_v41 = vpack.c.bf16 %v333_v32, %v329_v30 }
  0x43   : > { %839 = vmatpush.bf16.msra.mxu1 %v402_v15  ;;  %v335_v38 = vld [vmem:[%s2814_s28 + $0x30] sm:$0xff]  ;;  %v336_v40 = vld [vmem:[%s2814_s28 + $0x38] sm:$0xff]  ;;  %v394_v42 = vpack.c.bf16 %v334_v34, %v330_v33  ;;  %v466_v45 = vld [vmem:[%s4215_s2 + $0x48] sm:$0xff] }
  0x44   : > { %928 = vmatpush.bf16.msra.mxu2 %v403_v17  ;;  %621 = vperm.xlu1 %2590, %v483_v22   ;;  %v395_v43 = vpack.c.bf16 %v335_v38, %v331_v37  ;;  %v396_v44 = vpack.c.bf16 %v336_v40, %v332_v39  ;;  %v465_v46 = vld [vmem:[%s4215_s2 + $0x40] sm:$0xff]  ;;  %v463_v49 = vld [vmem:[%s4215_s2 + $0x30] sm:$0xff]  ;;  %v482_v50 = vld [vmem:[%s4215_s2 + $0xc8] sm:$0xff] }
  0x45   : > { %1017 = vmatpush.bf16.msra.mxu3 %v404_v21  ;;  %546 = vperm.xlu0 %2589, %v468_v25   ;;  %v2482_v47 = vld [vmem:[%s4214_s1] sm:$0xff]  ;;  %v464_v51 = vld [vmem:[%s4215_s2 + $0x38] sm:$0xff]  ;;  %v479_v53 = vld [vmem:[%s4215_s2 + $0xb0] sm:$0xff] }
  0x46   : > { %751 = vmatpush.bf16.msra.mxu0 %v397_v28  ;;  %626 = vperm.xlu2 %2591, %v484_v36   ;;  %v481_v48 = vld [vmem:[%s4215_s2 + $0xc0] sm:$0xff]  ;;  %v480_v52 = vld [vmem:[%s4215_s2 + $0xb8] sm:$0xff]  ;;  %v2483_v54 = vld [vmem:[%s4214_s1 + $0x8] sm:$0xff] }
  0x47   : > { %840 = vmatpush.bf16.msra.mxu1 %v398_v29  ;;  %v461_v55 = vld [vmem:[%s4215_s2 + $0x20] sm:$0xff]  ;;  %v462_v57 = vld [vmem:[%s4215_s2 + $0x28] sm:$0xff]  ;;  %v460_v59 = vld [vmem:[%s4215_s2 + $0x18] sm:$0xff] }
  0x48   : > { %929 = vmatpush.bf16.msra.mxu2 %v399_v31  ;;  %v477_v56 = vld [vmem:[%s4215_s2 + $0xa0] sm:$0xff]  ;;  %v478_v58 = vld [vmem:[%s4215_s2 + $0xa8] sm:$0xff]  ;;  %v459_v60 = vld [vmem:[%s4215_s2 + $0x10] sm:$0xff] }
  0x49   : > { %1018 = vmatpush.bf16.msra.mxu3 %v400_v35  ;;  %v2484_v61 = vld [vmem:[%s4214_s1 + $0x10] sm:$0xff]  ;;  %v457_v63 = vld [vmem:[%s4215_s2] sm:$0xff]  ;;  %v458_v0 = vld [vmem:[%s4215_s2 + $0x8] sm:$0xff] }
  0x4a   : > { %752 = vmatpush.bf16.msra.mxu0 %v393_v41  ;;  %v475_v62 = vld [vmem:[%s4215_s2 + $0x90] sm:$0xff]  ;;  %v2485_v1 = vld [vmem:[%s4214_s1 + $0x18] sm:$0xff]  ;;  %v2486_v3 = vld [vmem:[%s4214_s1 + $0x20] sm:$0xff] }
  0x4b   : > { %841 = vmatpush.bf16.msra.mxu1 %v394_v42  ;;  %v2487_v6 = vld [vmem:[%s4214_s1 + $0x28] sm:$0xff]  ;;  %v2488_v12 = vld [vmem:[%s4214_s1 + $0x30] sm:$0xff]  ;;  %v476_v16 = vld [vmem:[%s4215_s2 + $0x98] sm:$0xff] }
  0x4c   : > { %930 = vmatpush.bf16.msra.mxu2 %v395_v43  ;;  %536 = vperm.xlu1 %2590, %v466_v45   ;;  %v473_v19 = vld [vmem:[%s4215_s2 + $0x80] sm:$0xff]  ;;  %v2489_v21 = vld [vmem:[%s4214_s1 + $0x38] sm:$0xff]  ;;  %v474_v24 = vld [vmem:[%s4215_s2 + $0x88] sm:$0xff] }
  0x4d   : > { %1019 = vmatpush.bf16.msra.mxu3 %v396_v44  ;;  %531 = vperm.xlu0 %2589, %v465_v46   ;;  %v2490_v28 = vld [vmem:[%s4214_s1 + $0x40] sm:$0xff]  ;;  %v1452_v40 = vld [vmem:[%s4217_s4 + $0x78] sm:$0xff]  ;;  %v2491_v43 = vld [vmem:[%s4214_s1 + $0x48] sm:$0xff] }
  0x4e   : > { %753 = vmatmul.bf16.vlgmr.msra.gmra.mxu0 %v2482_v47  ;;  %842 = vmatmul.bf16.vlgmr.msra.gmra.mxu1 %v2482_v47 }
  0x4f   : > { %931 = vmatmul.bf16.vlgmr.msra.gmra.mxu2 %v2482_v47  ;;  %611 = vperm.xlu2 %2591, %v481_v48   ;;  %v1447_v48 = vld [vmem:[%s4217_s4 + $0x50] sm:$0xff] }
  0x50   : > { %1020 = vmatmul.bf16.vlgmr.msra.gmra.mxu3 %v2482_v47 }
  0x54   : > { %521 = vperm.xlu1 %2590, %v463_v49   ;;  %v1449_v49 = vld [vmem:[%s4217_s4 + $0x60] sm:$0xff] }
  0x55   : > { %616 = vperm.xlu0 %2589, %v482_v50  }
  0x57   : > { %526 = vperm.xlu2 %2591, %v464_v51  }
  0x5c   : > { %606 = vperm.xlu1 %2590, %v480_v52  }
  0x5d   : > { %601 = vperm.xlu0 %2589, %v479_v53  }
  0x5e   : > { %758 = vmatmul.bf16.gmra.mxu0 %v2483_v54  ;;  %847 = vmatmul.bf16.gmra.mxu1 %v2483_v54 }
  0x5f   : > { %936 = vmatmul.bf16.gmra.mxu2 %v2483_v54  ;;  %511 = vperm.xlu2 %2591, %v461_v55  }
  0x60   : > { %1025 = vmatmul.bf16.gmra.mxu3 %v2483_v54 }
  0x64   : > { %591 = vperm.xlu1 %2590, %v477_v56  }
  0x65   : > { %516 = vperm.xlu0 %2589, %v462_v57  }
  0x67   : > { %596 = vperm.xlu2 %2591, %v478_v58  }
  0x6c   : > { %506 = vperm.xlu1 %2590, %v460_v59  }
  0x6d   : > { %501 = vperm.xlu0 %2589, %v459_v60  }
  0x6e   : > { %763 = vmatmul.bf16.gmra.mxu0 %v2484_v61  ;;  %852 = vmatmul.bf16.gmra.mxu1 %v2484_v61 }
  0x6f   : > { %941 = vmatmul.bf16.gmra.mxu2 %v2484_v61  ;;  %581 = vperm.xlu2 %2591, %v475_v62  }
  0x70   : > { %1030 = vmatmul.bf16.gmra.mxu3 %v2484_v61 }
  0x74   : > { %491 = vperm.xlu1 %2590, %v457_v63  }
  0x75   : > { %586 = vperm.xlu0 %2589, %v476_v16  }
  0x77   : > { %496 = vperm.xlu2 %2591, %v458_v0  }
  0x7c   : > { %576 = vperm.xlu1 %2590, %v474_v24  }
  0x7d   : > { %571 = vperm.xlu0 %2589, %v473_v19  }
  0x7e   : > { %768 = vmatmul.bf16.gmra.mxu0 %v2485_v1  ;;  %857 = vmatmul.bf16.gmra.mxu1 %v2485_v1 }
  0x7f   : > { %946 = vmatmul.bf16.gmra.mxu2 %v2485_v1 }
  0x80   : > { %1035 = vmatmul.bf16.gmra.mxu3 %v2485_v1 }
  0x84   : > { %1515 = vperm.xlu1 %2590, %v1449_v49  }
  0x85   : > { %1530 = vperm.xlu0 %2589, %v1452_v40  }
  0x88   : > { %v2983_v2 = vpop.permute.xlu2 %551 }
  0x8d   : > { %1505 = vperm.xlu0 %2589, %v1447_v48  }
  0x8e   : > { %773 = vmatmul.bf16.gmra.mxu0 %v2486_v3  ;;  %862 = vmatmul.bf16.gmra.mxu1 %v2486_v3 }
  0x8f   : > { %951 = vmatmul.bf16.gmra.mxu2 %v2486_v3 }
  0x90   : > { %1040 = vmatmul.bf16.gmra.mxu3 %v2486_v3  ;;  %v2988_v4 = vpop.permute.xlu2 %556  ;;  %v1446_v3 = vld [vmem:[%s4217_s4 + $0x48] sm:$0xff] }
  0x95   : > { %1500 = vperm.xlu0 %2589, %v1446_v3   ;;  %v1443_v3 = vld [vmem:[%s4217_s4 + $0x30] sm:$0xff] }
  0x98   : > { %v2990_v5 = vpop.permute.xlu2 %541 }
  0x9e   : > { %778 = vmatmul.bf16.gmra.mxu0 %v2487_v6  ;;  %867 = vmatmul.bf16.gmra.mxu1 %v2487_v6  ;;  %v2995_v7 = vpop.permute.xlu1 %641 }
  0x9f   : > { %4272 = vst [vmem:[#allocation9_spill] sm:$0xff] %v2995_v7  ;;  %v2997_v8 = vpop.permute.xlu0 %561  ;;  %956 = vmatmul.bf16.gmra.mxu2 %v2487_v6 }
  0xa0   : > { %1045 = vmatmul.bf16.gmra.mxu3 %v2487_v6  ;;  %v2999_v9 = vpop.permute.xlu2 %626  ;;  %v1448_v6 = vld [vmem:[%s4217_s4 + $0x58] sm:$0xff] }
  0xa1   : > { %4273 = vst [vmem:[#allocation10_spill] sm:$0xff] %v2999_v9  ;;  %1510 = vperm.xlu1 %2590, %v1448_v6  }
  0xa6   : > { %v3001_v10 = vpop.permute.xlu1 %646 }
  0xa7   : > { %4274 = vst [vmem:[#allocation11_spill] sm:$0xff] %v3001_v10  ;;  %v3003_v11 = vpop.permute.xlu0 %566 }
  0xa9   : > { %v3008_v13 = vpop.permute.xlu2 %611  ;;  %1485 = vperm.xlu1 %2590, %v1443_v3  }
  0xaa   : > { %4275 = vst [vmem:[#allocation12_spill] sm:$0xff] %v3008_v13 }
  0xae   : > { %783 = vmatmul.bf16.gmra.mxu0 %v2488_v12  ;;  %872 = vmatmul.bf16.gmra.mxu1 %v2488_v12  ;;  %v3010_v14 = vpop.permute.xlu1 %636 }
  0xaf   : > { %4276 = vst [vmem:[#allocation13_spill] sm:$0xff] %v3010_v14  ;;  %961 = vmatmul.bf16.gmra.mxu2 %v2488_v12  ;;  %v3012_v15 = vpop.permute.xlu0 %631 }
  0xb0   : > { %4277 = vst [vmem:[#allocation14_spill] sm:$0xff] %v3012_v15  ;;  %1050 = vmatmul.bf16.gmra.mxu3 %v2488_v12 }
  0xb1   : > { %v3024_v20 = vpop.permute.xlu2 %526 }
  0xb6   : > { %v3017_v17 = vpop.permute.xlu1 %621 }
  0xb7   : > { %4278 = vst [vmem:[#allocation15_spill] sm:$0xff] %v3017_v17  ;;  %v3019_v18 = vpop.permute.xlu0 %546 }
  0xb8   : > { %4279 = vst [vmem:[#allocation16_spill] sm:$0xff] %v3019_v18 }
  0xb9   : > { %v3036_v25 = vpop.permute.xlu2 %511 }
  0xbe   : > { %788 = vmatmul.bf16.gmra.mxu0 %v2489_v21  ;;  %877 = vmatmul.bf16.gmra.mxu1 %v2489_v21  ;;  %v3029_v22 = vpop.permute.xlu1 %536 }
  0xbf   : > { %966 = vmatmul.bf16.gmra.mxu2 %v2489_v21  ;;  %v3031_v23 = vpop.permute.xlu0 %531 }
  0xc0   : > { %1055 = vmatmul.bf16.gmra.mxu3 %v2489_v21 }
  0xc1   : > { %v3045_v31 = vpop.permute.xlu2 %596 }
  0xc2   : > { %4281 = vst [vmem:[#allocation18_spill] sm:$0xff] %v3045_v31 }
  0xc6   : > { %v3038_v26 = vpop.permute.xlu1 %521 }
  0xc7   : > { %v3040_v27 = vpop.permute.xlu0 %616 }
  0xc8   : > { %4280 = vst [vmem:[#allocation17_spill] sm:$0xff] %v3040_v27 }
  0xc9   : > { %v3055_v38 = vpop.permute.xlu2 %581 }
  0xca   : > { %4284 = vst [vmem:[#allocation21_spill] sm:$0xff] %v3055_v38 }
  0xcb   : > { %v754_v29 = vpop.f32.mrf.mxu0  ;;  %v843_v30 = vpop.f32.mrf.mxu1 }
  0xce   : > { %793 = vmatmul.bf16.gmra.mxu0 %v2490_v28  ;;  %882 = vmatmul.bf16.gmra.mxu1 %v2490_v28  ;;  %v3047_v32 = vpop.permute.xlu1 %606 }
  0xcf   : > { %4282 = vst [vmem:[#allocation19_spill] sm:$0xff] %v3047_v32  ;;  %971 = vmatmul.bf16.gmra.mxu2 %v2490_v28  ;;  %v3049_v33 = vpop.permute.xlu0 %601 }
  0xd0   : > { %4283 = vst [vmem:[#allocation20_spill] sm:$0xff] %v3049_v33  ;;  %1060 = vmatmul.bf16.gmra.mxu3 %v2490_v28 }
  0xd1   : > { %v3081_v51 = vpop.permute.xlu2 %496 }
  0xd2   : > { %v3051_v34 = vpop.f32.mrf.mxu2 }
  0xd3   : > { %v3053_v35 = vpop.f32.mrf.mxu3  ;;  %v756_v36 = vpop.f32.mrf.mxu0 }
  0xd4   : > { %v845_v37 = vpop.f32.mrf.mxu1  ;;  %v757_v55 = vadd.f32 %v756_v36, %v3081_v51 }
  0xd5   : > { %v846_v56 = vadd.f32 %v845_v37, %v3081_v51 }
  0xd6   : > { %v3057_v39 = vpop.permute.xlu1 %591  ;;  %v1105_v12 = vmul.f32 0.2, %v757_v55 }
  0xd7   : > { %4285 = vst [vmem:[#allocation22_spill] sm:$0xff] %v3057_v39  ;;  %v3062_v41 = vpop.permute.xlu0 %516  ;;  %v1106_v16 = vmul.f32 0.2, %v846_v56 }
  0xda   : > { %v3064_v42 = vpop.f32.mrf.mxu2 }
  0xdb   : > { %v3069_v44 = vpop.f32.mrf.mxu3  ;;  %v759_v45 = vpop.f32.mrf.mxu0  ;;  %v935_v15 = vadd.f32 %v3064_v42, %v3081_v51 }
  0xdc   : > { %v848_v46 = vpop.f32.mrf.mxu1  ;;  %v1024_v13 = vadd.f32 %v3069_v44, %v3081_v51 }
  0xde   : > { %798 = vmatmul.bf16.gmra.mxu0 %v2491_v43  ;;  %887 = vmatmul.bf16.gmra.mxu1 %v2491_v43  ;;  %v3071_v47 = vpop.permute.xlu1 %506  ;;  %v1108_v17 = vmul.f32 0.2, %v1024_v13 }
  0xdf   : > { %976 = vmatmul.bf16.gmra.mxu2 %v2491_v43  ;;  %v3079_v50 = vpop.permute.xlu0 %501 }
  0xe0   : > { %1065 = vmatmul.bf16.gmra.mxu3 %v2491_v43  ;;  %v760_v52 = vadd.f32 %v759_v45, %v3079_v50  ;;  %v849_v53 = vadd.f32 %v848_v46, %v3079_v50  ;;  %v2492_v45 = vld [vmem:[%s4214_s1 + $0x50] sm:$0xff] }
  0xe2   : > { %v3085_v54 = vpop.f32.mrf.mxu2  ;;  %v1109_v61 = vmul.f32 0.2, %v760_v52  ;;  %v1110_v63 = vmul.f32 0.2, %v849_v53 }
  0xe3   : > { %v3089_v57 = vpop.f32.mrf.mxu3  ;;  %v761_v58 = vpop.f32.mrf.mxu0 }
  0xe4   : > { %v762_v59 = vadd.f32 %v761_v58, %v3071_v47  ;;  %v850_v60 = vpop.f32.mrf.mxu1  ;;  %v1237_v21 = vmax.f32 %v760_v52, %v1109_v61  ;;  %v1238_v37 = vmax.f32 %v849_v53, %v1110_v63  ;;  %v1234_v61 = vmax.f32 %v846_v56, %v1106_v16 }
  0xe5   : > { %v851_v62 = vadd.f32 %v850_v60, %v3071_v47 }
  0xe6   : > { %v1113_v0 = vmul.f32 0.2, %v762_v59  ;;  %v3093_v1 = vpop.permute.xlu1 %491 }
  0xe7   : > { %v1114_v19 = vmul.f32 0.2, %v851_v62  ;;  %v755_v28 = vadd.f32 %v754_v29, %v3093_v1  ;;  %v844_v36 = vadd.f32 %v843_v30, %v3093_v1  ;;  %v1233_v30 = vmax.f32 %v757_v55, %v1105_v12 }
  0xe8   : > { %v1241_v24 = vmax.f32 %v762_v59, %v1113_v0  ;;  %v1022_v27 = vadd.f32 %v3053_v35, %v3093_v1  ;;  %v933_v44 = vadd.f32 %v3051_v34, %v3093_v1  ;;  %v1107_v35 = vmul.f32 0.2, %v935_v15 }
  0xe9   : > { %v1242_v40 = vmax.f32 %v851_v62, %v1114_v19  ;;  %v1101_v48 = vmul.f32 0.2, %v755_v28  ;;  %v1102_v49 = vmul.f32 0.2, %v844_v36  ;;  %v1441_v62 = vld [vmem:[%s4217_s4 + $0x20] sm:$0xff] }
  0xea   : > { %v3103_v43 = vpop.f32.mrf.mxu2  ;;  %v3108_v46 = vpack.c.bf16 %v1241_v24, %v1237_v21  ;;  %1475 = vperm.xlu0 %2589, %v1441_v62   ;;  %v1104_v14 = vmul.f32 0.2, %v1022_v27  ;;  %v1235_v51 = vmax.f32 %v935_v15, %v1107_v35  ;;  %v2497_v15 = vld [vmem:[%s4214_s1 + $0x78] sm:$0xff] }
  0xeb   : > { %v3110_v58 = vpop.f32.mrf.mxu3  ;;  %v764_v52 = vpop.f32.mrf.mxu0  ;;  %v3112_v59 = vpack.c.bf16 %v1242_v40, %v1238_v37  ;;  %v1229_v60 = vmax.f32 %v755_v28, %v1101_v48  ;;  %v1230_v53 = vmax.f32 %v844_v36, %v1102_v49  ;;  %v1451_v28 = vld [vmem:[%s4217_s4 + $0x70] sm:$0xff]  ;;  %v1442_v48 = vld [vmem:[%s4217_s4 + $0x28] sm:$0xff] }
  0xec   : > { %4286 = vst [vmem:[#allocation23_spill] sm:$0xff] %v3108_v46  ;;  %v853_v29 = vpop.f32.mrf.mxu1  ;;  %v765_v55 = vadd.f32 %v764_v52, %v3036_v25  ;;  %1525 = vperm.xlu2 %2591, %v1451_v28   ;;  %1480 = vperm.xlu1 %2590, %v1442_v48  }
  0xed   : > { %4287 = vst [vmem:[#allocation24_spill] sm:$0xff] %v3112_v59  ;;  %v3117_v63 = vpack.c.bf16 %v1233_v30, %v1229_v60  ;;  %v3119_v0 = vpack.c.bf16 %v1234_v61, %v1230_v53  ;;  %v854_v56 = vadd.f32 %v853_v29, %v3036_v25  ;;  %v2493_v61 = vld [vmem:[%s4214_s1 + $0x58] sm:$0xff]  ;;  %v1103_v59 = vmul.f32 0.2, %v933_v44 }
  0xee   : > { %803 = vmatmul.bf16.gmra.mxu0 %v2492_v45  ;;  %892 = vmatmul.bf16.gmra.mxu1 %v2492_v45  ;;  %v1117_v19 = vmul.f32 0.2, %v765_v55 }
  0xef   : > { %4288 = vst [vmem:[#allocation25_spill] sm:$0xff] %v3117_v63  ;;  %981 = vmatmul.bf16.gmra.mxu2 %v2492_v45  ;;  %v1118_v36 = vmul.f32 0.2, %v854_v56  ;;  %v1232_v63 = vmax.f32 %v1022_v27, %v1104_v14  ;;  %v1231_v34 = vmax.f32 %v933_v44, %v1103_v59  ;;  %v938_v14 = vadd.f32 %v3085_v54, %v3079_v50 }
  0xf0   : > { %4289 = vst [vmem:[#allocation26_spill] sm:$0xff] %v3119_v0  ;;  %1070 = vmatmul.bf16.gmra.mxu3 %v2492_v45  ;;  %v1440_v45 = vld [vmem:[%s4217_s4 + $0x18] sm:$0xff]  ;;  %v1245_v52 = vmax.f32 %v765_v55, %v1117_v19  ;;  %v1450_v55 = vld [vmem:[%s4217_s4 + $0x68] sm:$0xff]  ;;  %v2218_v19 = vld [vmem:[%s4219_s6] sm:$0x7]  ;;  %v1236_v0 = vmax.f32 %v1024_v13, %v1108_v17  ;;  %v1027_v13 = vadd.f32 %v3089_v57, %v3079_v50 }
  0xf1   : > { %v1246_v60 = vmax.f32 %v854_v56, %v1118_v36  ;;  %v1437_v56 = vld [vmem:[%s4217_s4] sm:$0xff]  ;;  %v1029_v17 = vadd.f32 %v3110_v58, %v3071_v47  ;;  %v3248_v1 = vpack.c.bf16 %v1235_v51, %v1231_v34  ;;  %v1111_v50 = vmul.f32 0.2, %v938_v14 }
  0xf2   : > { %v3126_v6 = vpop.f32.mrf.mxu2  ;;  %1470 = vperm.xlu0 %2589, %v1440_v45   ;;  %v1112_v27 = vmul.f32 0.2, %v1027_v13 }
  0xf3   : > { %v3128_v12 = vpop.f32.mrf.mxu3  ;;  %v766_v16 = vpop.f32.mrf.mxu0  ;;  %4301 = vst [vmem:[#allocation38_spill] sm:$0xff] %v3248_v1 }
  0xf4   : > { %v767_v21 = vadd.f32 %v766_v16, %v3062_v41  ;;  %v855_v24 = vpop.f32.mrf.mxu1  ;;  %1520 = vperm.xlu2 %2591, %v1450_v55   ;;  %1455 = vperm.xlu1 %2590, %v1437_v56   ;;  %v3261_v57 = vadd.f32 %v3128_v12, %v3036_v25  ;;  %v1240_v54 = vmax.f32 %v1027_v13, %v1112_v27 }
  0xf5   : > { %v856_v37 = vadd.f32 %v855_v24, %v3062_v41 }
  0xf6   : > { %v1121_v40 = vmul.f32 0.2, %v767_v21 }
  0xf7   : > { %v1122_v49 = vmul.f32 0.2, %v856_v37 }
  0xf8   : > { %v1249_v29 = vmax.f32 %v767_v21, %v1121_v40 }
  0xf9   : > { %v1250_v30 = vmax.f32 %v856_v37, %v1122_v49 }
  0xfa   : > { %v3141_v53 = vpop.f32.mrf.mxu2  ;;  %v3146_v62 = vpack.c.bf16 %v1249_v29, %v1245_v52  ;;  %2221 = vperm.xlu0 %2589, %v2218_v19   ;;  %v1445_v29 = vld [vmem:[%s4217_s4 + $0x40] sm:$0xff] }
  0xfb   : > { %v3148_v3 = vpop.f32.mrf.mxu3  ;;  %v769_v16 = vpop.f32.mrf.mxu0  ;;  %v3150_v24 = vpack.c.bf16 %v1250_v30, %v1246_v60 }
  0xfc   : > { %4290 = vst [vmem:[#allocation27_spill] sm:$0xff] %v3146_v62  ;;  %v858_v28 = vpop.f32.mrf.mxu1  ;;  %v770_v21 = vadd.f32 %v769_v16, %v3038_v26  ;;  %1495 = vperm.xlu2 %2591, %v1445_v29   ;;  %v3274_v12 = vadd.f32 %v3148_v3, %v3062_v41 }
  0xfd   : > { %4291 = vst [vmem:[#allocation28_spill] sm:$0xff] %v3150_v24  ;;  %v859_v36 = vadd.f32 %v858_v28, %v3038_v26 }
  0xfe   : > { %808 = vmatmul.bf16.gmra.mxu0 %v2493_v61  ;;  %897 = vmatmul.bf16.gmra.mxu1 %v2493_v61  ;;  %v1125_v48 = vmul.f32 0.2, %v770_v21 }
  0xff   : > { %986 = vmatmul.bf16.gmra.mxu2 %v2493_v61  ;;  %v1126_v60 = vmul.f32 0.2, %v859_v36 }
 0x100   : > { %1075 = vmatmul.bf16.gmra.mxu3 %v2493_v61  ;;  %v1253_v28 = vmax.f32 %v770_v21, %v1125_v48  ;;  %v1444_v21 = vld [vmem:[%s4217_s4 + $0x38] sm:$0xff] }
 0x101   : > { %v1254_v56 = vmax.f32 %v859_v36, %v1126_v60 }
 0x102   : > { %v3163_v37 = vpop.f32.mrf.mxu2 }
 0x103   : > { %v3165_v40 = vpop.f32.mrf.mxu3  ;;  %v771_v45 = vpop.f32.mrf.mxu0 }
 0x104   : > { %v772_v49 = vadd.f32 %v771_v45, %v3024_v20  ;;  %v860_v52 = vpop.f32.mrf.mxu1  ;;  %v2494_v45 = vld [vmem:[%s4214_s1 + $0x60] sm:$0xff]  ;;  %1490 = vperm.xlu2 %2591, %v1444_v21   ;;  %v3308_v3 = vadd.f32 %v3165_v40, %v3038_v26 }
 0x105   : > { %v861_v30 = vadd.f32 %v860_v52, %v3024_v20 }
 0x106   : > { %v1129_v61 = vmul.f32 0.2, %v772_v49 }
 0x107   : > { %v1130_v16 = vmul.f32 0.2, %v861_v30 }
 0x108   : > { %v1257_v55 = vmax.f32 %v772_v49, %v1129_v61 }
 0x109   : > { %v1258_v19 = vmax.f32 %v861_v30, %v1130_v16  ;;  %v1439_v30 = vld [vmem:[%s4217_s4 + $0x10] sm:$0xff]  ;;  %v2495_v16 = vld [vmem:[%s4214_s1 + $0x68] sm:$0xff] }
 0x10a   : > { %v3172_v38 = vpop.f32.mrf.mxu2  ;;  %v3177_v39 = vpack.c.bf16 %v1257_v55, %v1253_v28 }
 0x10b   : > { %v3179_v31 = vpop.f32.mrf.mxu3  ;;  %v3181_v33 = vpop.f32.mrf.mxu0  ;;  %v3183_v52 = vpack.c.bf16 %v1258_v19, %v1254_v56  ;;  %v1438_v19 = vld [vmem:[%s4217_s4 + $0x8] sm:$0xff] }
 0x10c   : > { %v3185_v29 = vpop.f32.mrf.mxu1  ;;  %1465 = vperm.xlu2 %2591, %v1439_v30  }
 0x10e   : > { %813 = vmatmul.bf16.gmra.mxu0 %v2494_v45  ;;  %902 = vmatmul.bf16.gmra.mxu1 %v2494_v45 }
 0x10f   : > { %991 = vmatmul.bf16.gmra.mxu2 %v2494_v45 }
 0x110   : > { %1080 = vmatmul.bf16.gmra.mxu3 %v2494_v45 }
 0x112   : > { %v3190_v36 = vpop.f32.mrf.mxu2 }
 0x113   : > { %4292 = vst [vmem:[#allocation29_spill] sm:$0xff] %v3190_v36  ;;  %v3192_v48 = vpop.f32.mrf.mxu3  ;;  %v3194_v49 = vpop.f32.mrf.mxu0 }
 0x114   : > { %4293 = vst [vmem:[#allocation30_spill] sm:$0xff] %v3192_v48  ;;  %v3196_v60 = vpop.f32.mrf.mxu1  ;;  %1460 = vperm.xlu2 %2591, %v1438_v19  }
 0x11a   : > { %v3201_v61 = vpop.f32.mrf.mxu2 }
 0x11b   : > { %4294 = vst [vmem:[#allocation31_spill] sm:$0xff] %v3201_v61  ;;  %v3206_v28 = vpop.f32.mrf.mxu3  ;;  %v3208_v55 = vpop.f32.mrf.mxu0 }
 0x11c   : > { %4295 = vst [vmem:[#allocation32_spill] sm:$0xff] %v3206_v28  ;;  %v3210_v56 = vpop.f32.mrf.mxu1  ;;  %v3240_v28 = vpack.c.bf16 %v1236_v0, %v1232_v63  ;;  %v940_v63 = vadd.f32 %v3103_v43, %v3071_v47  ;;  %v1116_v0 = vmul.f32 0.2, %v1029_v17  ;;  %v3267_v47 = vadd.f32 %v3126_v6, %v3036_v25 }
 0x11d   : > { %v3270_v43 = vmul.f32 0.2, %v3261_v57 }
 0x11e   : > { %818 = vmatmul.bf16.gmra.mxu0 %v2495_v16  ;;  %907 = vmatmul.bf16.gmra.mxu1 %v2495_v16  ;;  %4300 = vst [vmem:[#allocation37_spill] sm:$0xff] %v3240_v28  ;;  %v1115_v35 = vmul.f32 0.2, %v940_v63  ;;  %v1244_v51 = vmax.f32 %v1029_v17, %v1116_v0  ;;  %v1239_v17 = vmax.f32 %v938_v14, %v1111_v50  ;;  %v3284_v6 = vmul.f32 0.2, %v3267_v47 }
 0x11f   : > { %996 = vmatmul.bf16.gmra.mxu2 %v2495_v16 }
 0x120   : > { %1085 = vmatmul.bf16.gmra.mxu3 %v2495_v16  ;;  %v2496_v16 = vld [vmem:[%s4214_s1 + $0x70] sm:$0xff]  ;;  %v1243_v27 = vmax.f32 %v940_v63, %v1115_v35  ;;  %v3281_v25 = vpack.c.bf16 %v1244_v51, %v1240_v54  ;;  %v3302_v51 = vadd.f32 %v3163_v37, %v3038_v26  ;;  %v869_v26 = vadd.f32 %v3210_v56, %v2990_v5 }
 0x121   : > { %v950_v56 = vadd.f32 %v3172_v38, %v3024_v20 }
 0x122   : > { %v3215_v45 = vpop.f32.mrf.mxu2  ;;  %4303 = vst [vmem:[#allocation40_spill] sm:$0xff] %v3281_v25 }
 0x123   : > { %4296 = vst [vmem:[#allocation33_spill] sm:$0xff] %v3215_v45  ;;  %v3217_v21 = vpop.f32.mrf.mxu3  ;;  %v3219_v30 = vpop.f32.mrf.mxu0 }
 0x124   : > { %4297 = vst [vmem:[#allocation34_spill] sm:$0xff] %v3217_v21  ;;  %v3221_v32 = vpop.f32.mrf.mxu1  ;;  %v777_v21 = vadd.f32 %v3194_v49, %v3029_v22 }
 0x125   : > { %v871_v37 = vadd.f32 %v3221_v32, %v3019_v18 }
 0x12a   : > { %v3227_v19 = vpop.f32.mrf.mxu2 }
 0x12b   : > { %4298 = vst [vmem:[#allocation35_spill] sm:$0xff] %v3227_v19  ;;  %v3232_v9 = vpop.f32.mrf.mxu3  ;;  %v784_v10 = vpop.f32.mrf.mxu0 }
 0x12c   : > { %4299 = vst [vmem:[#allocation36_spill] sm:$0xff] %v3232_v9  ;;  %v873_v7 = vpop.f32.mrf.mxu1  ;;  %v3316_v9 = vpack.c.bf16 %v1243_v27, %v1239_v17 }
 0x12e   : > { %823 = vmatmul.bf16.gmra.mxu0 %v2496_v16  ;;  %912 = vmatmul.bf16.gmra.mxu1 %v2496_v16 }
 0x12f   : > { %1001 = vmatmul.bf16.gmra.mxu2 %v2496_v16 }
 0x130   : > { %1090 = vmatmul.bf16.gmra.mxu3 %v2496_v16 }
 0x132   : > { %v3238_v46 = vpop.f32.mrf.mxu2 }
 0x133   : > { %v3242_v61 = vpop.f32.mrf.mxu3  ;;  %v786_v42 = vpop.f32.mrf.mxu0 }
 0x134   : > { %v875_v48 = vpop.f32.mrf.mxu1  ;;  %v787_v0 = vadd.f32 %v786_v42, %v2988_v4  ;;  %v3296_v42 = vmul.f32 0.2, %v3274_v12 }
 0x136   : > { %v1153_v1 = vmul.f32 0.2, %v787_v0  ;;  %v1252_v38 = vmax.f32 %v3274_v12, %v3296_v42 }
 0x138   : > { %v1281_v32 = vmax.f32 %v787_v0, %v1153_v1  ;;  %v1142_v1 = vmul.f32 0.2, %v869_v26 }
 0x13a   : > { %v3254_v16 = vpop.f32.mrf.mxu2 }
 0x13b   : > { %v3263_v58 = vpop.f32.mrf.mxu3  ;;  %v789_v59 = vpop.f32.mrf.mxu0 }
 0x13c   : > { %4302 = vst [vmem:[#allocation39_spill] sm:$0xff] %v3263_v58  ;;  %v878_v44 = vpop.f32.mrf.mxu1  ;;  %v790_v34 = vadd.f32 %v789_v59, %v2997_v8  ;;  %v3290_v59 = vadd.f32 %v3141_v53, %v3062_v41  ;;  %v874_v41 = vadd.f32 %v873_v7, %v2983_v2 }
 0x13d   : > { %v879_v13 = vadd.f32 %v878_v44, %v2997_v8  ;;  %v785_v44 = vadd.f32 %v784_v10, %v2983_v2  ;;  %v782_v10 = vadd.f32 %v3219_v30, %v3019_v18  ;;  %v866_v18 = vadd.f32 %v3196_v60, %v3029_v22 }
 0x13e   : > { %828 = vmatmul.bf16.gmra.mxu0 %v2497_v15  ;;  %917 = vmatmul.bf16.gmra.mxu1 %v2497_v15  ;;  %v1157_v50 = vmul.f32 0.2, %v790_v34  ;;  %v1150_v40 = vmul.f32 0.2, %v874_v41  ;;  %v864_v60 = vadd.f32 %v3185_v29, %v3031_v23 }
 0x13f   : > { %1006 = vmatmul.bf16.gmra.mxu2 %v2497_v15  ;;  %v1158_v53 = vmul.f32 0.2, %v879_v13  ;;  %v1149_v24 = vmul.f32 0.2, %v785_v44 }
 0x140   : > { %1095 = vmatmul.bf16.gmra.mxu3 %v2497_v15  ;;  %v876_v15 = vadd.f32 %v875_v48, %v2988_v4  ;;  %v1285_v62 = vmax.f32 %v790_v34, %v1157_v50  ;;  %v1146_v34 = vmul.f32 0.2, %v871_v37 }
 0x141   : > { %v1286_v30 = vmax.f32 %v879_v13, %v1158_v53  ;;  %v775_v13 = vadd.f32 %v3181_v33, %v3031_v23 }
 0x142   : > { %v3279_v28 = vpop.f32.mrf.mxu2  ;;  %v1154_v36 = vmul.f32 0.2, %v876_v15 }
 0x143   : > { %v3293_v14 = vpop.f32.mrf.mxu3  ;;  %v791_v63 = vpop.f32.mrf.mxu0 }
 0x144   : > { %v792_v54 = vadd.f32 %v791_v63, %v3003_v11  ;;  %v880_v35 = vpop.f32.mrf.mxu1  ;;  %v780_v63 = vadd.f32 %v3208_v55, %v2990_v5  ;;  %v1145_v55 = vmul.f32 0.2, %v782_v10  ;;  %v1282_v50 = vmax.f32 %v876_v15, %v1154_v36 }
 0x145   : > { %v881_v48 = vadd.f32 %v880_v35, %v3003_v11  ;;  %v1137_v36 = vmul.f32 0.2, %v777_v21  ;;  %v1138_v15 = vmul.f32 0.2, %v866_v18 }
 0x146   : > { %v1161_v25 = vmul.f32 0.2, %v792_v54  ;;  %v1141_v49 = vmul.f32 0.2, %v780_v63  ;;  %v1273_v33 = vmax.f32 %v782_v10, %v1145_v55 }
 0x147   : > { %v1162_v7 = vmul.f32 0.2, %v881_v48  ;;  %v1265_v10 = vmax.f32 %v777_v21, %v1137_v36 }
 0x148   : > { %v1289_v35 = vmax.f32 %v792_v54, %v1161_v25  ;;  %v1277_v54 = vmax.f32 %v785_v44, %v1149_v24  ;;  %v1123_v24 = vmul.f32 0.2, %v3290_v59  ;;  %v1269_v29 = vmax.f32 %v780_v63, %v1141_v49 }
 0x149   : > { %v1290_v19 = vmax.f32 %v881_v48, %v1162_v7  ;;  %v1127_v48 = vmul.f32 0.2, %v3302_v51 }
 0x14a   : > { %v969_v45 = vpop.f32.mrf.mxu2  ;;  %v1385_v58 = vpack.c.bf16 %v1289_v35, %v1285_v62  ;;  %v1039_v62 = vadd.f32 %v3179_v31, %v3024_v20  ;;  %v1381_v0 = vpack.c.bf16 %v1281_v32, %v1277_v54  ;;  %v1128_v20 = vmul.f32 0.2, %v3308_v3 }
 0x14b   : > { %v1058_v25 = vpop.f32.mrf.mxu3  ;;  %v3324_v17 = vpop.f32.mrf.mxu0  ;;  %v1386_v27 = vpack.c.bf16 %v1290_v19, %v1286_v30  ;;  %v1278_v19 = vmax.f32 %v874_v41, %v1150_v40  ;;  %v1133_v31 = vmul.f32 0.2, %v775_v13  ;;  %v1131_v41 = vmul.f32 0.2, %v950_v56 }
 0x14c   : > { %v3330_v53 = vpop.f32.mrf.mxu1  ;;  %1613 = vmatpush.bf16.msrb.mxu0 %v1385_v58  ;;  %v1274_v58 = vmax.f32 %v871_v37, %v1146_v34  ;;  %v1132_v7 = vmul.f32 0.2, %v1039_v62  ;;  %v1134_v35 = vmul.f32 0.2, %v864_v60  ;;  %v1270_v40 = vmax.f32 %v869_v26, %v1142_v1 }
 0x14d   : > { %1711 = vmatpush.bf16.msrb.mxu2 %v1386_v27  ;;  %v1382_v44 = vpack.c.bf16 %v1282_v50, %v1278_v19  ;;  %v1377_v42 = vpack.c.bf16 %v1273_v33, %v1269_v29  ;;  %v4305_v30 = vmax.f32 %v3261_v57, %v3270_v43  ;;  %v1266_v34 = vmax.f32 %v866_v18, %v1138_v15 }
 0x14e   : > { %v1378_v63 = vpack.c.bf16 %v1274_v58, %v1270_v40  ;;  %v1247_v27 = vmax.f32 %v3267_v47, %v3284_v6  ;;  %v1251_v26 = vmax.f32 %v3290_v59, %v1123_v24  ;;  %v1255_v50 = vmax.f32 %v3302_v51, %v1127_v48  ;;  %v4313_v58 = vld [vmem:[#allocation35_spill] sm:$0xff] }
 0x14f   : > { %v3346_v37 = vpack.c.bf16 %v1252_v38, %v4305_v30  ;;  %v1261_v49 = vmax.f32 %v775_v13, %v1133_v31  ;;  %v1256_v57 = vmax.f32 %v3308_v3, %v1128_v20  ;;  %v1259_v43 = vmax.f32 %v950_v56, %v1131_v41  ;;  %v4315_v31 = vld [vmem:[#allocation27_spill] sm:$0xff]  ;;  %v4316_v41 = vld [vmem:[#allocation28_spill] sm:$0xff] }
 0x150   : > { %1614 = vmatpush.bf16.msrb.mxu0 %v1381_v0  ;;  %v1260_v54 = vmax.f32 %v1039_v62, %v1132_v7  ;;  %v1262_v1 = vmax.f32 %v864_v60, %v1134_v35  ;;  %v3359_v18 = vpack.c.bf16 %v1251_v26, %v1247_v27  ;;  %v968_v47 = vadd.f32 %v3279_v28, %v2997_v8  ;;  %v4320_v26 = vld [vmem:[#allocation30_spill] sm:$0xff] }
 0x151   : > { %1712 = vmatpush.bf16.msrb.mxu2 %v1382_v44  ;;  %v1373_v19 = vpack.c.bf16 %v1265_v10, %v1261_v49  ;;  %v970_v6 = vadd.f32 %v969_v45, %v3003_v11  ;;  %v3364_v59 = vpack.c.bf16 %v1259_v43, %v1255_v50  ;;  %v1057_v3 = vadd.f32 %v3293_v14, %v2997_v8  ;;  %v4309_v14 = vld [vmem:[#allocation39_spill] sm:$0xff]  ;;  %v4318_v10 = vld [vmem:[#allocation29_spill] sm:$0xff]  ;;  %v4322_v43 = vld [vmem:[#allocation32_spill] sm:$0xff] }
 0x152   : > { %v3341_v12 = vpop.f32.mrf.mxu2  ;;  %v1374_v38 = vpack.c.bf16 %v1266_v34, %v1262_v1  ;;  %v3366_v51 = vpack.c.bf16 %v1260_v54, %v1256_v57  ;;  %v1059_v56 = vadd.f32 %v1058_v25, %v3003_v11  ;;  %v963_v28 = vadd.f32 %v3238_v46, %v2983_v2  ;;  %v4311_v46 = vld [vmem:[#allocation34_spill] sm:$0xff]  ;;  %v4321_v49 = vld [vmem:[#allocation31_spill] sm:$0xff] }
 0x153   : > { %4304 = vst [vmem:[#allocation41_spill] sm:$0xff] %v3341_v12  ;;  %v3348_v55 = vpop.f32.mrf.mxu3  ;;  %v3350_v32 = vpop.f32.mrf.mxu0  ;;  %v965_v45 = vadd.f32 %v3254_v16, %v2988_v4  ;;  %v1159_v0 = vmul.f32 0.2, %v968_v47  ;;  %v1163_v8 = vmul.f32 0.2, %v970_v6  ;;  %v1052_v11 = vadd.f32 %v3242_v61, %v2983_v2  ;;  %v4312_v16 = vld [vmem:[#allocation16_spill] sm:$0xff] }
 0x154   : > { %4306 = vst [vmem:[#allocation42_spill] sm:$0xff] %v3348_v55  ;;  %v3356_v21 = vpop.f32.mrf.mxu1  ;;  %1615 = vmatpush.bf16.msrb.mxu0 %v1377_v42  ;;  %v1054_v25 = vadd.f32 %v4309_v14, %v2988_v4  ;;  %v1160_v33 = vmul.f32 0.2, %v1057_v3  ;;  %v1164_v24 = vmul.f32 0.2, %v1059_v56  ;;  %v3393_v44 = vadd.f32 %v4311_v46, %v2990_v5  ;;  %v4356_v55 = vld [vmem:[#allocation14_spill] sm:$0xff] }
 0x155   : > { %1713 = vmatpush.bf16.msrb.mxu2 %v1378_v63  ;;  %v960_v48 = vadd.f32 %v4313_v58, %v4312_v16  ;;  %v1151_v2 = vmul.f32 0.2, %v963_v28  ;;  %v1155_v61 = vmul.f32 0.2, %v965_v45  ;;  %v1287_v4 = vmax.f32 %v968_v47, %v1159_v0  ;;  %v2418_v47 = vld [vmem:[%s4216_s3] sm:$0xf] }
 0x156   : > { %v1291_v29 = vmax.f32 %v970_v6, %v1163_v8  ;;  %v1152_v7 = vmul.f32 0.2, %v1052_v11  ;;  %v1156_v35 = vmul.f32 0.2, %v1054_v25  ;;  %v1288_v40 = vmax.f32 %v1057_v3, %v1160_v33  ;;  %v4324_v8 = vld [vmem:[#allocation24_spill] sm:$0xff]  ;;  %v4326_v58 = vld [vmem:[#allocation25_spill] sm:$0xff] }
 0x157   : > { %v1292_v42 = vmax.f32 %v1059_v56, %v1164_v24  ;;  %v953_v30 = vadd.f32 %v4318_v10, %v3031_v23  ;;  %v1042_v50 = vadd.f32 %v4320_v26, %v3031_v23  ;;  %v955_v57 = vadd.f32 %v4321_v49, %v3029_v22  ;;  %v2499_v23 = vld [vmem:[%s4216_s3 + $0x4] sm:$0xf0] }
 0x158   : > { %1616 = vmatpush.bf16.msrb.mxu0 %v1373_v19  ;;  %v1044_v54 = vadd.f32 %v4322_v43, %v3029_v22  ;;  %v1144_v1 = vmul.f32 0.2, %v3393_v44  ;;  %v1147_v6 = vmul.f32 0.2, %v960_v48  ;;  %v1279_v3 = vmax.f32 %v963_v28, %v1151_v2  ;;  %v4327_v10 = vld [vmem:[#allocation26_spill] sm:$0xff] }
 0x159   : > { %1714 = vmatpush.bf16.msrb.mxu2 %v1374_v38  ;;  %v4323_v38 = vld [vmem:[#allocation23_spill] sm:$0xff]  ;;  %v1283_v56 = vmax.f32 %v965_v45, %v1155_v61  ;;  %v1387_v0 = vpack.c.bf16 %v1291_v29, %v1287_v4  ;;  %v1280_v14 = vmax.f32 %v1052_v11, %v1152_v7  ;;  %v1284_v33 = vmax.f32 %v1054_v25, %v1156_v35 }
 0x15a   : > { %v3371_v13 = vpop.f32.mrf.mxu2  ;;  %v1388_v24 = vpack.c.bf16 %v1292_v42, %v1288_v40  ;;  %v1135_v46 = vmul.f32 0.2, %v953_v30  ;;  %v1140_v45 = vmul.f32 0.2, %v1044_v54  ;;  %v1272_v2 = vmax.f32 %v3393_v44, %v1144_v1 }
 0x15b   : > { %4307 = vst [vmem:[#allocation43_spill] sm:$0xff] %v3371_v13  ;;  %v3373_v62 = vpop.f32.mrf.mxu3  ;;  %v3375_v60 = vpop.f32.mrf.mxu0  ;;  %v1383_v28 = vpack.c.bf16 %v1283_v56, %v1279_v3  ;;  %v1384_v25 = vpack.c.bf16 %v1284_v33, %v1280_v14 }
 0x15c   : > { %4308 = vst [vmem:[#allocation44_spill] sm:$0xff] %v3373_v62  ;;  %v3377_v36 = vpop.f32.mrf.mxu1  ;;  %1617 = vmatpush.bf16.msrb.mxu0 %v3177_v39  ;;  %v4310_v39 = vld [vmem:[#allocation33_spill] sm:$0xff] }
 0x15d   : > { %1715 = vmatpush.bf16.msrb.mxu2 %v3183_v52  ;;  %v958_v15 = vadd.f32 %v4310_v39, %v2990_v5  ;;  %v4314_v52 = vld [vmem:[#allocation36_spill] sm:$0xff]  ;;  %v3426_v39 = vor.u32 %v2499_v23, %v2418_v47  ;;  %v4355_v62 = vld [vmem:[#allocation13_spill] sm:$0xff] }
 0x15e   : > { %v1049_v20 = vadd.f32 %v4314_v52, %v4312_v16  ;;  %v1136_v16 = vmul.f32 0.2, %v1042_v50  ;;  %v1139_v52 = vmul.f32 0.2, %v955_v57 }
 0x15f   : > { %v1143_v63 = vmul.f32 0.2, %v958_v15  ;;  %4325 = vst [vmem:[#allocation34_spill] sm:$0xff] %v3426_v39 }
 0x160   : > { %1618 = vmatpush.bf16.msrb.mxu0 %v4315_v31  ;;  %v1148_v22 = vmul.f32 0.2, %v1049_v20  ;;  %v1267_v7 = vmax.f32 %v955_v57, %v1139_v52  ;;  %v1264_v44 = vmax.f32 %v1042_v50, %v1136_v16  ;;  %v2501_v50 = vld [vmem:[%s4216_s3 + $0x14] sm:$0xf0] }
 0x161   : > { %1716 = vmatpush.bf16.msrb.mxu2 %v4316_v41  ;;  %v1271_v31 = vmax.f32 %v958_v15, %v1143_v63  ;;  %v1275_v41 = vmax.f32 %v960_v48, %v1147_v6  ;;  %v1263_v48 = vmax.f32 %v953_v30, %v1135_v46  ;;  %v2426_v30 = vld [vmem:[%s4216_s3 + $0x10] sm:$0xf]  ;;  %v4336_v6 = vld [vmem:[#allocation40_spill] sm:$0xff] }
 0x162   : > { %v3401_v5 = vpop.f32.mrf.mxu2  ;;  %v1276_v61 = vmax.f32 %v1049_v20, %v1148_v22  ;;  %v1268_v20 = vmax.f32 %v1044_v54, %v1140_v45  ;;  %v3455_v57 = vor.u32 %v2501_v50, %v2426_v30 }
 0x163   : > { %4317 = vst [vmem:[#allocation39_spill] sm:$0xff] %v3401_v5  ;;  %v3405_v34 = vpop.f32.mrf.mxu3  ;;  %v3407_v27 = vpop.f32.mrf.mxu0  ;;  %v1379_v35 = vpack.c.bf16 %v1275_v41, %v1271_v31  ;;  %v1375_v42 = vpack.c.bf16 %v1267_v7, %v1263_v48  ;;  %v2442_v31 = vld [vmem:[%s4216_s3 + $0x30] sm:$0xf]  ;;  %v2505_v41 = vld [vmem:[%s4216_s3 + $0x34] sm:$0xf0] }
 0x164   : > { %4319 = vst [vmem:[#allocation33_spill] sm:$0xff] %v3405_v34  ;;  %v3416_v19 = vpop.f32.mrf.mxu1  ;;  %1619 = vmatpush.bf16.msrb.mxu0 %v4323_v38  ;;  %v1380_v40 = vpack.c.bf16 %v1276_v61, %v1272_v2  ;;  %v1376_v26 = vpack.c.bf16 %v1268_v20, %v1264_v44  ;;  %v2450_v7 = vld [vmem:[%s4216_s3 + $0x40] sm:$0xf]  ;;  %v4357_v34 = vld [vmem:[#allocation11_spill] sm:$0xff] }
 0x165   : > { %1717 = vmatpush.bf16.msrb.mxu2 %v4324_v8  ;;  %4332 = vst [vmem:[#allocation28_spill] sm:$0xff] %v3455_v57 }
 0x168   : > { %1620 = vmatpush.bf16.msrb.mxu0 %v4326_v58 }
 0x169   : > { %1718 = vmatpush.bf16.msrb.mxu2 %v4327_v10  ;;  %v3515_v10 = vor.u32 %v2505_v41, %v2442_v31 }
 0x16a   : > { %v3431_v11 = vpop.f32.mrf.mxu2 }
 0x16b   : > { %4328 = vst [vmem:[#allocation16_spill] sm:$0xff] %v3431_v11  ;;  %v3433_v4 = vpop.f32.mrf.mxu3  ;;  %v3435_v29 = vpop.f32.mrf.mxu0  ;;  %1621 = vmatmul.bf16.vlgmr.msrb.gmra.mxu0 %v3426_v39 }
 0x16c   : > { %1809 = vmatpush.bf16.msra.mxu0 %v1387_v0  ;;  %4329 = vst [vmem:[#allocation35_spill] sm:$0xff] %v3433_v4  ;;  %v3438_v15 = vpop.f32.mrf.mxu1  ;;  %1719 = vmatmul.bf16.vlgmr.msrb.gmra.mxu2 %v3426_v39  ;;  %v2434_v0 = vld [vmem:[%s4216_s3 + $0x20] sm:$0xf] }
 0x16d   : > { %1907 = vmatpush.bf16.msra.mxu2 %v1388_v24 }
 0x170   : > { %1810 = vmatpush.bf16.msra.mxu0 %v1383_v28 }
 0x171   : > { %1908 = vmatpush.bf16.msra.mxu2 %v1384_v25 }
 0x172   : > { %v3441_v63 = vpop.f32.mrf.mxu2 }
 0x173   : > { %4330 = vst [vmem:[#allocation36_spill] sm:$0xff] %v3441_v63  ;;  %v3443_v49 = vpop.f32.mrf.mxu3  ;;  %v3445_v43 = vpop.f32.mrf.mxu0 }
 0x174   : > { %1811 = vmatpush.bf16.msra.mxu0 %v1379_v35  ;;  %4331 = vst [vmem:[#allocation27_spill] sm:$0xff] %v3443_v49  ;;  %v3447_v1 = vpop.f32.mrf.mxu1  ;;  %v2507_v35 = vld [vmem:[%s4216_s3 + $0x44] sm:$0xf0] }
 0x175   : > { %1909 = vmatpush.bf16.msra.mxu2 %v1380_v40  ;;  %v3533_v40 = vor.u32 %v2507_v35, %v2450_v7 }
 0x177   : > { %4350 = vst [vmem:[#allocation48_spill] sm:$0xff] %v3533_v40 }
 0x178   : > { %1812 = vmatpush.bf16.msra.mxu0 %v1375_v42 }
 0x179   : > { %1910 = vmatpush.bf16.msra.mxu2 %v1376_v26 }
 0x17a   : > { %v3458_v54 = vpop.f32.mrf.mxu2 }
 0x17b   : > { %4333 = vst [vmem:[#allocation29_spill] sm:$0xff] %v3458_v54  ;;  %v3461_v38 = vpop.f32.mrf.mxu3  ;;  %v3463_v47 = vpop.f32.mrf.mxu0  ;;  %1626 = vmatmul.bf16.gmra.mxu0 %v3455_v57  ;;  %v4358_v54 = vld [vmem:[#allocation10_spill] sm:$0xff] }
 0x17c   : > { %1813 = vmatpush.bf16.msra.mxu0 %v3364_v59  ;;  %4334 = vst [vmem:[#allocation30_spill] sm:$0xff] %v3461_v38  ;;  %v3466_v23 = vpop.f32.mrf.mxu1  ;;  %1724 = vmatmul.bf16.gmra.mxu2 %v3455_v57  ;;  %v3557_v57 = vpop.permute.xlu0 %586 }
 0x17d   : > { %1911 = vmatpush.bf16.msra.mxu2 %v3366_v51 }
 0x180   : > { %1814 = vmatpush.bf16.msra.mxu0 %v3359_v18  ;;  %v4338_v18 = vld [vmem:[#allocation38_spill] sm:$0xff] }
 0x181   : > { %1912 = vmatpush.bf16.msra.mxu2 %v3346_v37  ;;  %v2503_v37 = vld [vmem:[%s4216_s3 + $0x24] sm:$0xf0]  ;;  %4345 = vst [vmem:[#allocation38_spill] sm:$0xff] %v3515_v10 }
 0x182   : > { %v3472_v59 = vpop.f32.mrf.mxu2  ;;  %v3489_v8 = vor.u32 %v2503_v37, %v2434_v0  ;;  %v2458_v37 = vld [vmem:[%s4216_s3 + $0x50] sm:$0xf] }
 0x183   : > { %4335 = vst [vmem:[#allocation31_spill] sm:$0xff] %v3472_v59  ;;  %v3475_v51 = vpop.f32.mrf.mxu3  ;;  %v3477_v3 = vpop.f32.mrf.mxu0 }
 0x184   : > { %1815 = vmatpush.bf16.msra.mxu0 %v3316_v9  ;;  %4337 = vst [vmem:[#allocation32_spill] sm:$0xff] %v3475_v51  ;;  %v3479_v56 = vpop.f32.mrf.mxu1  ;;  %v4339_v9 = vld [vmem:[#allocation37_spill] sm:$0xff]  ;;  %v4359_v51 = vld [vmem:[#allocation15_spill] sm:$0xff] }
 0x185   : > { %1913 = vmatpush.bf16.msra.mxu2 %v4336_v6  ;;  %4340 = vst [vmem:[#allocation23_spill] sm:$0xff] %v3489_v8 }
 0x188   : > { %1816 = vmatpush.bf16.msra.mxu0 %v4338_v18  ;;  %v2509_v18 = vld [vmem:[%s4216_s3 + $0x54] sm:$0xf0] }
 0x189   : > { %1914 = vmatpush.bf16.msra.mxu2 %v4339_v9  ;;  %v3547_v9 = vor.u32 %v2509_v18, %v2458_v37 }
 0x18a   : > { %v3491_v22 = vpop.f32.mrf.mxu2 }
 0x18b   : > { %4341 = vst [vmem:[#allocation24_spill] sm:$0xff] %v3491_v22  ;;  %v3493_v14 = vpop.f32.mrf.mxu3  ;;  %v3495_v33 = vpop.f32.mrf.mxu0  ;;  %1631 = vmatmul.bf16.gmra.mxu0 %v3489_v8 }
 0x18c   : > { %4342 = vst [vmem:[#allocation25_spill] sm:$0xff] %v3493_v14  ;;  %v3498_v24 = vpop.f32.mrf.mxu1  ;;  %1729 = vmatmul.bf16.gmra.mxu2 %v3489_v8 }
 0x18d   : > { %4353 = vst [vmem:[#allocation51_spill] sm:$0xff] %v3547_v9 }
 0x192   : > { %v3501_v46 = vpop.f32.mrf.mxu2 }
 0x193   : > { %4343 = vst [vmem:[#allocation26_spill] sm:$0xff] %v3501_v46  ;;  %v3503_v16 = vpop.f32.mrf.mxu3  ;;  %v3505_v58 = vpop.f32.mrf.mxu0 }
 0x194   : > { %4344 = vst [vmem:[#allocation40_spill] sm:$0xff] %v3503_v16  ;;  %v3507_v52 = vpop.f32.mrf.mxu1 }
 0x19a   : > { %v3518_v45 = vpop.f32.mrf.mxu2 }
 0x19b   : > { %v819_v28 = vpop.f32.mrf.mxu0  ;;  %1636 = vmatmul.bf16.gmra.mxu0 %v3515_v10  ;;  %4346 = vst [vmem:[#allocation37_spill] sm:$0xff] %v3518_v45  ;;  %v3521_v61 = vpop.f32.mrf.mxu3 }
 0x19c   : > { %v908_v2 = vpop.f32.mrf.mxu1  ;;  %1734 = vmatmul.bf16.gmra.mxu2 %v3515_v10  ;;  %4347 = vst [vmem:[#allocation45_spill] sm:$0xff] %v3521_v61  ;;  %v820_v46 = vadd.f32 %v819_v28, %v4359_v51  ;;  %v4361_v28 = vld [vmem:[#allocation12_spill] sm:$0xff] }
 0x1a2   : > { %v3529_v44 = vpop.f32.mrf.mxu2 }
 0x1a3   : > { %v821_v25 = vpop.f32.mrf.mxu0  ;;  %4348 = vst [vmem:[#allocation46_spill] sm:$0xff] %v3529_v44  ;;  %v3531_v20 = vpop.f32.mrf.mxu3 }
 0x1a4   : > { %v910_v48 = vpop.f32.mrf.mxu1  ;;  %4349 = vst [vmem:[#allocation47_spill] sm:$0xff] %v3531_v20  ;;  %v822_v49 = vadd.f32 %v821_v25, %v4358_v54  ;;  %v909_v20 = vadd.f32 %v908_v2, %v4359_v51 }
 0x1a5   : > { %v911_v14 = vadd.f32 %v910_v48, %v4358_v54 }
 0x1aa   : > { %v3537_v30 = vpop.f32.mrf.mxu2 }
 0x1ab   : > { %v824_v42 = vpop.f32.mrf.mxu0  ;;  %1641 = vmatmul.bf16.gmra.mxu0 %v3533_v40  ;;  %4351 = vst [vmem:[#allocation49_spill] sm:$0xff] %v3537_v30  ;;  %v3539_v50 = vpop.f32.mrf.mxu3  ;;  %v1209_v30 = vmul.f32 0.2, %v822_v49 }
 0x1ac   : > { %v913_v26 = vpop.f32.mrf.mxu1  ;;  %1739 = vmatmul.bf16.gmra.mxu2 %v3533_v40  ;;  %4352 = vst [vmem:[#allocation50_spill] sm:$0xff] %v3539_v50  ;;  %v4354_v40 = vld [vmem:[#allocation9_spill] sm:$0xff]  ;;  %v825_v12 = vadd.f32 %v824_v42, %v4356_v55 }
 0x1ad   : > { %v4360_v50 = vld [vmem:[#allocation17_spill] sm:$0xff] }
 0x1ae   : > { %v1213_v59 = vmul.f32 0.2, %v825_v12  ;;  %v3583_v25 = vadd.f32 %v3505_v58, %v4360_v50  ;;  %v1206_v58 = vmul.f32 0.2, %v909_v20 }
 0x1b0   : > { %v1341_v2 = vmax.f32 %v825_v12, %v1213_v59 }
 0x1b2   : > { %v3549_v31 = vpop.f32.mrf.mxu2 }
 0x1b3   : > { %v826_v6 = vpop.f32.mrf.mxu0  ;;  %v3551_v41 = vpop.f32.mrf.mxu3 }
 0x1b4   : > { %v915_v0 = vpop.f32.mrf.mxu1  ;;  %v827_v13 = vadd.f32 %v826_v6, %v4355_v62  ;;  %v914_v6 = vadd.f32 %v913_v26, %v4356_v55 }
 0x1b5   : > { %v916_v37 = vadd.f32 %v915_v0, %v4355_v62 }
 0x1b6   : > { %v1217_v63 = vmul.f32 0.2, %v827_v13  ;;  %v1214_v45 = vmul.f32 0.2, %v914_v6 }
 0x1b7   : > { %v1218_v39 = vmul.f32 0.2, %v916_v37 }
 0x1b8   : > { %v1345_v54 = vmax.f32 %v827_v13, %v1217_v63  ;;  %v904_v63 = vadd.f32 %v3498_v24, %v4361_v28 }
 0x1ba   : > { %v3562_v4 = vpop.f32.mrf.mxu2  ;;  %v1413_v59 = vpack.c.bf16 %v1345_v54, %v1341_v2  ;;  %v1198_v54 = vmul.f32 0.2, %v904_v63 }
 0x1bb   : > { %v829_v7 = vpop.f32.mrf.mxu0  ;;  %1646 = vmatmul.bf16.gmra.mxu0 %v3547_v9  ;;  %v3572_v0 = vpop.f32.mrf.mxu3 }
 0x1bc   : > { %v918_v35 = vpop.f32.mrf.mxu1  ;;  %1744 = vmatmul.bf16.gmra.mxu2 %v3547_v9  ;;  %v830_v10 = vadd.f32 %v829_v7, %v4354_v40  ;;  %v2466_v7 = vld [vmem:[%s4216_s3 + $0x60] sm:$0xf] }
 0x1bd   : > { %v919_v8 = vadd.f32 %v918_v35, %v4354_v40  ;;  %v2511_v35 = vld [vmem:[%s4216_s3 + $0x64] sm:$0xf0] }
 0x1be   : > { %v1221_v11 = vmul.f32 0.2, %v830_v10  ;;  %v3577_v16 = vor.u32 %v2511_v35, %v2466_v7  ;;  %v906_v7 = vadd.f32 %v3507_v52, %v4360_v50  ;;  %v1210_v35 = vmul.f32 0.2, %v911_v14 }
 0x1bf   : > { %v1222_v9 = vmul.f32 0.2, %v919_v8  ;;  %v1342_v52 = vmax.f32 %v914_v6, %v1214_v45  ;;  %v4363_v6 = vld [vmem:[#allocation20_spill] sm:$0xff] }
 0x1c0   : > { %v1349_v61 = vmax.f32 %v830_v10, %v1221_v11  ;;  %v3588_v10 = vpop.permute.xlu0 %571  ;;  %v1338_v45 = vmax.f32 %v911_v14, %v1210_v35 }
 0x1c1   : > { %v1350_v44 = vmax.f32 %v919_v8, %v1222_v9  ;;  %v815_v8 = vadd.f32 %v3495_v33, %v4361_v28  ;;  %v3595_v13 = vadd.f32 %v3324_v17, %v3588_v10  ;;  %v1201_v33 = vmul.f32 0.2, %v3583_v25 }
 0x1c2   : > { %v3604_v12 = vpop.f32.mrf.mxu2  ;;  %v1202_v9 = vmul.f32 0.2, %v906_v7 }
 0x1c3   : > { %v831_v18 = vpop.f32.mrf.mxu0 }
 0x1c4   : > { %v832_v5 = vadd.f32 %v831_v18, %v4357_v34  ;;  %v920_v38 = vpop.f32.mrf.mxu1 }
 0x1c5   : > { %v921_v42 = vadd.f32 %v920_v38, %v4357_v34 }
 0x1c6   : > { %v1225_v18 = vmul.f32 0.2, %v832_v5 }
 0x1c7   : > { %v1226_v22 = vmul.f32 0.2, %v921_v42 }
 0x1c8   : > { %v1353_v26 = vmax.f32 %v832_v5, %v1225_v18  ;;  %v1346_v5 = vmax.f32 %v916_v37, %v1218_v39  ;;  %v4362_v39 = vld [vmem:[#allocation19_spill] sm:$0xff]  ;;  %v3610_v37 = vpop.f32.mrf.mxu3 }
 0x1c9   : > { %v1354_v38 = vmax.f32 %v921_v42, %v1226_v22  ;;  %v1205_v22 = vmul.f32 0.2, %v820_v46  ;;  %v3608_v17 = vadd.f32 %v3479_v56, %v4362_v39  ;;  %v810_v42 = vadd.f32 %v3463_v47, %v4363_v6 }
 0x1ca   : > { %v1417_v48 = vpack.c.bf16 %v1353_v26, %v1349_v61  ;;  %v3601_v61 = vadd.f32 %v3477_v3, %v4362_v39  ;;  %v1414_v24 = vpack.c.bf16 %v1346_v5, %v1342_v52  ;;  %v1197_v3 = vmul.f32 0.2, %v815_v8  ;;  %v4365_v5 = vld [vmem:[#allocation22_spill] sm:$0xff] }
 0x1cb   : > { %1651 = vmatmul.bf16.gmra.mxu0 %v3577_v16  ;;  %v1418_v11 = vpack.c.bf16 %v1354_v38, %v1350_v44  ;;  %v1337_v44 = vmax.f32 %v822_v49, %v1209_v30  ;;  %v1333_v18 = vmax.f32 %v820_v46, %v1205_v22  ;;  %v3615_v26 = vmul.f32 0.2, %v3595_v13  ;;  %v4364_v30 = vld [vmem:[#allocation18_spill] sm:$0xff] }
 0x1cc   : > { %1749 = vmatmul.bf16.gmra.mxu2 %v3577_v16  ;;  %1662 = vmatpush.bf16.msrb.mxu1 %v1417_v48  ;;  %v899_v49 = vadd.f32 %v3466_v23, %v4363_v6  ;;  %v1334_v56 = vmax.f32 %v909_v20, %v1206_v58  ;;  %v3621_v38 = vadd.f32 %v3445_v43, %v4364_v30  ;;  %v1193_v14 = vmul.f32 0.2, %v3601_v61  ;;  %v3642_v58 = vpop.permute.xlu1 %576 }
 0x1cd   : > { %1760 = vmatpush.bf16.msrb.mxu3 %v1418_v11  ;;  %v1409_v48 = vpack.c.bf16 %v1337_v44, %v1333_v18  ;;  %v1329_v47 = vmax.f32 %v3583_v25, %v1201_v33  ;;  %v3627_v46 = vadd.f32 %v3447_v1, %v4364_v30  ;;  %v1194_v35 = vmul.f32 0.2, %v3608_v17  ;;  %v2474_v25 = vld [vmem:[%s4216_s3 + $0x70] sm:$0xf]  ;;  %v2513_v1 = vld [vmem:[%s4216_s3 + $0x74] sm:$0xf0] }
 0x1ce   : > { %v1410_v11 = vpack.c.bf16 %v1338_v45, %v1334_v56  ;;  %v1330_v23 = vmax.f32 %v906_v7, %v1202_v9  ;;  %v3632_v20 = vadd.f32 %v3330_v53, %v3588_v10  ;;  %v805_v43 = vadd.f32 %v3435_v29, %v4365_v5 }
 0x1cf   : > { %v1189_v22 = vmul.f32 0.2, %v810_v42  ;;  %v1325_v2 = vmax.f32 %v815_v8, %v1197_v3  ;;  %v3646_v53 = vadd.f32 %v3407_v27, %v3557_v57  ;;  %v894_v29 = vadd.f32 %v3438_v15, %v4365_v5 }
 0x1d0   : > { %1663 = vmatpush.bf16.msrb.mxu1 %v1413_v59  ;;  %v1190_v7 = vmul.f32 0.2, %v899_v49  ;;  %v1326_v8 = vmax.f32 %v904_v63, %v1198_v54  ;;  %v3652_v52 = vadd.f32 %v3416_v19, %v3557_v57  ;;  %v1185_v33 = vmul.f32 0.2, %v3621_v38  ;;  %v4366_v63 = vld [vmem:[#allocation21_spill] sm:$0xff]  ;;  %v1009_v54 = vpop.f32.mrf.mxu2 }
 0x1d1   : > { %1761 = vmatpush.bf16.msrb.mxu3 %v1414_v24  ;;  %v1405_v59 = vpack.c.bf16 %v1329_v47, %v1325_v2  ;;  %v1321_v44 = vmax.f32 %v3601_v61, %v1193_v14  ;;  %v1186_v9 = vmul.f32 0.2, %v3627_v46  ;;  %v3657_v27 = vor.u32 %v2513_v1, %v2474_v25 }
 0x1d2   : > { %v1406_v24 = vpack.c.bf16 %v1330_v23, %v1326_v8  ;;  %v1322_v45 = vmax.f32 %v3608_v17, %v1194_v35  ;;  %v3662_v15 = vadd.f32 %v3350_v32, %v3642_v58  ;;  %v800_v19 = vadd.f32 %v3375_v60, %v4366_v63 }
 0x1d3   : > { %v1181_v3 = vmul.f32 0.2, %v805_v43  ;;  %v1317_v18 = vmax.f32 %v810_v42, %v1189_v22  ;;  %v3668_v61 = vadd.f32 %v3356_v21, %v3642_v58  ;;  %v889_v56 = vadd.f32 %v3377_v36, %v4366_v63 }
 0x1d4   : > { %1664 = vmatpush.bf16.msrb.mxu1 %v1409_v48  ;;  %v1182_v14 = vmul.f32 0.2, %v894_v29  ;;  %v1318_v17 = vmax.f32 %v899_v49, %v1190_v7  ;;  %v1098_v48 = vpop.f32.mrf.mxu3  ;;  %v1166_v32 = vmul.f32 0.2, %v3632_v20  ;;  %v1177_v47 = vmul.f32 0.2, %v3646_v53 }
 0x1d5   : > { %1762 = vmatpush.bf16.msrb.mxu3 %v1410_v11  ;;  %v1401_v60 = vpack.c.bf16 %v1321_v44, %v1317_v18  ;;  %v1313_v42 = vmax.f32 %v3621_v38, %v1185_v33  ;;  %v1178_v35 = vmul.f32 0.2, %v3652_v52  ;;  %v1010_v11 = vadd.f32 %v1009_v54, %v4357_v34 }
 0x1d6   : > { %v1402_v21 = vpack.c.bf16 %v1322_v45, %v1318_v17  ;;  %v1314_v36 = vmax.f32 %v3627_v46, %v1186_v9  ;;  %v1169_v49 = vmul.f32 0.2, %v3662_v15  ;;  %v1173_v23 = vmul.f32 0.2, %v800_v19  ;;  %v4370_v17 = vld [vmem:[#allocation46_spill] sm:$0xff] }
 0x1d7   : > { %v1309_v22 = vmax.f32 %v805_v43, %v1181_v3  ;;  %v1099_v2 = vadd.f32 %v1098_v48, %v4357_v34  ;;  %v1170_v38 = vmul.f32 0.2, %v3668_v61  ;;  %v1174_v25 = vmul.f32 0.2, %v889_v56 }
 0x1d8   : > { %1665 = vmatpush.bf16.msrb.mxu1 %v1405_v59  ;;  %v1310_v1 = vmax.f32 %v894_v29, %v1182_v14  ;;  %v1008_v7 = vadd.f32 %v3604_v12, %v4354_v40  ;;  %v1293_v46 = vmax.f32 %v3595_v13, %v3615_v26  ;;  %v1097_v8 = vadd.f32 %v3610_v37, %v4354_v40 }
 0x1d9   : > { %1763 = vmatpush.bf16.msrb.mxu3 %v1406_v24  ;;  %v1397_v43 = vpack.c.bf16 %v1313_v42, %v1309_v22  ;;  %v1305_v34 = vmax.f32 %v3646_v53, %v1177_v47  ;;  %v3692_v33 = vadd.f32 %v3562_v4, %v4355_v62  ;;  %v1227_v59 = vmul.f32 0.2, %v1010_v11  ;;  %v4371_v42 = vld [vmem:[#allocation37_spill] sm:$0xff] }
 0x1da   : > { %v1398_v44 = vpack.c.bf16 %v1314_v36, %v1310_v1  ;;  %v1306_v29 = vmax.f32 %v3652_v52, %v1178_v35  ;;  %v1301_v9 = vmax.f32 %v800_v19, %v1173_v23  ;;  %v3697_v12 = vadd.f32 %v3572_v0, %v4355_v62  ;;  %v4367_v0 = vld [vmem:[#allocation10_spill] sm:$0xff]  ;;  %v4368_v19 = vld [vmem:[#allocation49_spill] sm:$0xff] }
 0x1db   : > { %1656 = vmatmul.bf16.gmra.mxu0 %v3657_v27  ;;  %v1228_v13 = vmul.f32 0.2, %v1099_v2  ;;  %v1297_v40 = vmax.f32 %v3662_v15, %v1169_v49  ;;  %v1302_v37 = vmax.f32 %v889_v56, %v1174_v25  ;;  %v1003_v26 = vadd.f32 %v3549_v31, %v4356_v55  ;;  %v4369_v31 = vld [vmem:[#allocation50_spill] sm:$0xff]  ;;  %v4373_v25 = vld [vmem:[#allocation45_spill] sm:$0xff] }
 0x1dc   : > { %1754 = vmatmul.bf16.gmra.mxu2 %v3657_v27  ;;  %1666 = vmatpush.bf16.msrb.mxu1 %v1401_v60  ;;  %v1223_v53 = vmul.f32 0.2, %v1008_v7  ;;  %v1298_v4 = vmax.f32 %v3668_v61, %v1170_v38  ;;  %v1294_v24 = vmax.f32 %v3632_v20, %v1166_v32  ;;  %v1092_v52 = vadd.f32 %v3551_v41, %v4356_v55  ;;  %v2498_v55 = vld [vmem:[%s4216_s3 + $0x4] sm:$0xf]  ;;  %v2420_v41 = vld [vmem:[%s4216_s3 + $0x8] sm:$0xf0] }
 0x1dd   : > { %1764 = vmatpush.bf16.msrb.mxu3 %v1402_v21  ;;  %v1224_v45 = vmul.f32 0.2, %v1097_v8  ;;  %v1393_v62 = vpack.c.bf16 %v1305_v34, %v1301_v9  ;;  %v3708_v3 = vadd.f32 %v4368_v19, %v4367_v0  ;;  %v1219_v15 = vmul.f32 0.2, %v3692_v33  ;;  %v4375_v34 = vld [vmem:[#allocation26_spill] sm:$0xff]  ;;  %v4377_v9 = vld [vmem:[#allocation40_spill] sm:$0xff] }
 0x1de   : > { %v1355_v18 = vmax.f32 %v1010_v11, %v1227_v59  ;;  %v1394_v54 = vpack.c.bf16 %v1306_v29, %v1302_v37  ;;  %v3713_v56 = vadd.f32 %v4369_v31, %v4367_v0  ;;  %v1220_v61 = vmul.f32 0.2, %v3697_v12  ;;  %v4372_v11 = vld [vmem:[#allocation47_spill] sm:$0xff]  ;;  %v4378_v37 = vld [vmem:[#allocation24_spill] sm:$0xff] }
 0x1df   : > { %v1356_v20 = vmax.f32 %v1099_v2, %v1228_v13  ;;  %v1389_v14 = vpack.c.bf16 %v1297_v40, %v1293_v46  ;;  %v998_v48 = vadd.f32 %v4370_v17, %v4359_v51  ;;  %v1215_v32 = vmul.f32 0.2, %v1003_v26  ;;  %v4381_v19 = vld [vmem:[#allocation36_spill] sm:$0xff] }
 0x1e0   : > { %1667 = vmatpush.bf16.msrb.mxu1 %v1397_v43  ;;  %v1351_v47 = vmax.f32 %v1008_v7, %v1223_v53  ;;  %v1390_v60 = vpack.c.bf16 %v1298_v4, %v1294_v24  ;;  %v3726_v35 = vadd.f32 %v4371_v42, %v4360_v50  ;;  %v1087_v21 = vadd.f32 %v4372_v11, %v4359_v51  ;;  %v4374_v51 = vld [vmem:[#allocation31_spill] sm:$0xff] }
 0x1e1   : > { %1765 = vmatpush.bf16.msrb.mxu3 %v1398_v44  ;;  %v1216_v36 = vmul.f32 0.2, %v1092_v52  ;;  %v1352_v49 = vmax.f32 %v1097_v8, %v1224_v45  ;;  %v1211_v23 = vmul.f32 0.2, %v3708_v3  ;;  %v1347_v22 = vmax.f32 %v3692_v33, %v1219_v15  ;;  %v4382_v15 = vld [vmem:[#allocation27_spill] sm:$0xff] }
 0x1e2   : > { %v1419_v2 = vpack.c.bf16 %v1355_v18, %v1351_v47  ;;  %v3732_v38 = vor.u32 %v2498_v55, %v2420_v41  ;;  %v3736_v1 = vadd.f32 %v4373_v25, %v4360_v50  ;;  %v1212_v7 = vmul.f32 0.2, %v3713_v56  ;;  %v4376_v50 = vld [vmem:[#allocation32_spill] sm:$0xff]  ;;  %v4385_v11 = vld [vmem:[#allocation39_spill] sm:$0xff] }
 0x1e3   : > { %v1348_v46 = vmax.f32 %v3697_v12, %v1220_v61  ;;  %v1420_v43 = vpack.c.bf16 %v1356_v20, %v1352_v49  ;;  %v3742_v8 = vadd.f32 %v4374_v51, %v4363_v6  ;;  %v993_v33 = vadd.f32 %v4375_v34, %v4361_v28 }
 0x1e4   : > { %1668 = vmatpush.bf16.msrb.mxu1 %v1393_v62  ;;  %v1207_v59 = vmul.f32 0.2, %v998_v48  ;;  %v1343_v44 = vmax.f32 %v1003_v26, %v1215_v32  ;;  %v3748_v29 = vadd.f32 %v4376_v50, %v4363_v6  ;;  %v1082_v12 = vadd.f32 %v4377_v9, %v4361_v28  ;;  %v4379_v26 = vld [vmem:[#allocation34_spill] sm:$0xff]  ;;  %v4380_v6 = vld [vmem:[#allocation25_spill] sm:$0xff]  ;;  %v2428_v50 = vld [vmem:[%s4216_s3 + $0x18] sm:$0xf0] }
 0x1e5   : > { %1766 = vmatpush.bf16.msrb.mxu3 %v1394_v54  ;;  %v1208_v13 = vmul.f32 0.2, %v1087_v21  ;;  %v1344_v40 = vmax.f32 %v1092_v52, %v1216_v36  ;;  %v990_v53 = vadd.f32 %v4378_v37, %v4362_v39  ;;  %v1203_v4 = vmul.f32 0.2, %v3726_v35  ;;  %v4389_v9 = vld [vmem:[#allocation41_spill] sm:$0xff] }
 0x1e6   : > { %v1339_v24 = vmax.f32 %v3708_v3, %v1211_v23  ;;  %v1415_v45 = vpack.c.bf16 %v1347_v22, %v1343_v44  ;;  %v1079_v62 = vadd.f32 %v4380_v6, %v4362_v39  ;;  %v1204_v28 = vmul.f32 0.2, %v3736_v1  ;;  %v4383_v39 = vld [vmem:[#allocation29_spill] sm:$0xff] }
 0x1e7   : > { %v1340_v52 = vmax.f32 %v3713_v56, %v1212_v7  ;;  %v1416_v0 = vpack.c.bf16 %v1348_v46, %v1344_v40  ;;  %v3766_v3 = vadd.f32 %v4381_v19, %v4365_v5  ;;  %v3770_v18 = vadd.f32 %v4382_v15, %v4365_v5  ;;  %v4384_v56 = vld [vmem:[#allocation30_spill] sm:$0xff]  ;;  %v4391_v40 = vld [vmem:[#allocation43_spill] sm:$0xff] }
 0x1e8   : > { %1669 = vmatpush.bf16.msrb.mxu1 %v1389_v14  ;;  %v1199_v54 = vmul.f32 0.2, %v993_v33  ;;  %v1335_v31 = vmax.f32 %v998_v48, %v1207_v59  ;;  %v985_v61 = vadd.f32 %v4383_v39, %v4364_v30  ;;  %v3776_v20 = vadd.f32 %v4384_v56, %v4364_v30  ;;  %v4386_v30 = vld [vmem:[#allocation33_spill] sm:$0xff] }
 0x1e9   : > { %1767 = vmatpush.bf16.msrb.mxu3 %v1390_v60  ;;  %v1200_v14 = vmul.f32 0.2, %v1082_v12  ;;  %v1336_v55 = vmax.f32 %v1087_v21, %v1208_v13  ;;  %v1191_v41 = vmul.f32 0.2, %v3742_v8  ;;  %v1195_v17 = vmul.f32 0.2, %v990_v53 }
 0x1ea   : > { %v1331_v32 = vmax.f32 %v3726_v35, %v1203_v4  ;;  %v1411_v5 = vpack.c.bf16 %v1339_v24, %v1335_v31  ;;  %v1192_v47 = vmul.f32 0.2, %v3748_v29  ;;  %v1196_v48 = vmul.f32 0.2, %v1079_v62  ;;  %v4387_v21 = vld [vmem:[#allocation16_spill] sm:$0xff]  ;;  %v4388_v35 = vld [vmem:[#allocation35_spill] sm:$0xff] }
 0x1eb   : > { %1670 = vmatmul.bf16.vlgmr.msrb.gmra.mxu1 %v3732_v38  ;;  %1817 = vmatmul.bf16.vlgmr.msra.gmra.mxu0 %v4379_v26  ;;  %v1332_v60 = vmax.f32 %v3736_v1, %v1204_v28  ;;  %v1412_v42 = vpack.c.bf16 %v1340_v52, %v1336_v55  ;;  %v978_v36 = vadd.f32 %v4385_v11, %v4366_v63  ;;  %v1183_v25 = vmul.f32 0.2, %v3766_v3  ;;  %v2436_v11 = vld [vmem:[%s4216_s3 + $0x28] sm:$0xf0] }
 0x1ec   : > { %1858 = vmatpush.bf16.msra.mxu1 %v1419_v2  ;;  %1768 = vmatmul.bf16.vlgmr.msrb.gmra.mxu3 %v3732_v38  ;;  %v1067_v49 = vadd.f32 %v4386_v30, %v4366_v63  ;;  %v980_v23 = vadd.f32 %v4387_v21, %v3557_v57  ;;  %v1327_v22 = vmax.f32 %v993_v33, %v1199_v54  ;;  %v1184_v7 = vmul.f32 0.2, %v3770_v18  ;;  %v4394_v30 = vld [vmem:[#allocation23_spill] sm:$0xff]  ;;  %v2444_v21 = vld [vmem:[%s4216_s3 + $0x38] sm:$0xf0] }
 0x1ed   : > { %1956 = vmatpush.bf16.msra.mxu3 %v1420_v43  ;;  %1915 = vmatmul.bf16.vlgmr.msra.gmra.mxu2 %v4379_v26  ;;  %v1069_v2 = vadd.f32 %v4388_v35, %v3557_v57  ;;  %v1328_v1 = vmax.f32 %v1082_v12, %v1200_v14  ;;  %v1187_v46 = vmul.f32 0.2, %v985_v61  ;;  %v1319_v43 = vmax.f32 %v3742_v8, %v1191_v41  ;;  %v2500_v57 = vld [vmem:[%s4216_s3 + $0x14] sm:$0xf]  ;;  %v4390_v8 = vld [vmem:[#allocation42_spill] sm:$0xff] }
 0x1ee   : > { %v1323_v51 = vmax.f32 %v990_v53, %v1195_v17  ;;  %v1407_v34 = vpack.c.bf16 %v1331_v32, %v1327_v22  ;;  %v1188_v63 = vmul.f32 0.2, %v3776_v20  ;;  %v1320_v59 = vmax.f32 %v3748_v29, %v1192_v47  ;;  %v4392_v29 = vld [vmem:[#allocation44_spill] sm:$0xff] }
 0x1ef   : > { %v1324_v33 = vmax.f32 %v1079_v62, %v1196_v48  ;;  %v1408_v44 = vpack.c.bf16 %v1332_v60, %v1328_v1  ;;  %v973_v12 = vadd.f32 %v4389_v9, %v3588_v10  ;;  %v1062_v13 = vadd.f32 %v4390_v8, %v3588_v10  ;;  %v3836_v22 = vpop.f32.mrf.mxu2  ;;  %v2506_v1 = vld [vmem:[%s4216_s3 + $0x44] sm:$0xf]  ;;  %v4397_v9 = vld [vmem:[#allocation51_spill] sm:$0xff] }
 0x1f0   : > { %1859 = vmatpush.bf16.msra.mxu1 %v1415_v45  ;;  %v975_v37 = vadd.f32 %v4391_v40, %v3642_v58  ;;  %v1064_v53 = vadd.f32 %v4392_v29, %v3642_v58  ;;  %v1175_v4 = vmul.f32 0.2, %v978_v36  ;;  %v1176_v24 = vmul.f32 0.2, %v1067_v49  ;;  %v2468_v29 = vld [vmem:[%s4216_s3 + $0x68] sm:$0xf0] }
 0x1f1   : > { %1957 = vmatpush.bf16.msra.mxu3 %v1416_v0  ;;  %v1179_v26 = vmul.f32 0.2, %v980_v23  ;;  %v1311_v45 = vmax.f32 %v3766_v3, %v1183_v25  ;;  %v1315_v6 = vmax.f32 %v985_v61, %v1187_v46  ;;  %v1403_v62 = vpack.c.bf16 %v1323_v51, %v1319_v43  ;;  %v4393_v3 = vld [vmem:[#allocation28_spill] sm:$0xff]  ;;  %v2452_v46 = vld [vmem:[%s4216_s3 + $0x48] sm:$0xf0] }
 0x1f2   : > { %v3810_v28 = vor.u32 %v2500_v57, %v2428_v50  ;;  %v1180_v52 = vmul.f32 0.2, %v1069_v2  ;;  %v1312_v10 = vmax.f32 %v3770_v18, %v1184_v7  ;;  %v1316_v0 = vmax.f32 %v3776_v20, %v1188_v63  ;;  %v4396_v63 = vld [vmem:[#allocation48_spill] sm:$0xff] }
 0x1f3   : > { %v1404_v19 = vpack.c.bf16 %v1324_v33, %v1320_v59  ;;  %v1167_v15 = vmul.f32 0.2, %v973_v12  ;;  %v1168_v54 = vmul.f32 0.2, %v1062_v13  ;;  %v1171_v58 = vmul.f32 0.2, %v975_v37 }
 0x1f4   : > { %1860 = vmatpush.bf16.msra.mxu1 %v1411_v5  ;;  %v1303_v31 = vmax.f32 %v978_v36, %v1175_v4  ;;  %v1307_v39 = vmax.f32 %v980_v23, %v1179_v26  ;;  %v1399_v61 = vpack.c.bf16 %v1315_v6, %v1311_v45  ;;  %v1172_v56 = vmul.f32 0.2, %v1064_v53  ;;  %v1622_v23 = vpop.f32.mrf.mxu0  ;;  %v2460_v57 = vld [vmem:[%s4216_s3 + $0x58] sm:$0xf0] }
 0x1f5   : > { %1958 = vmatpush.bf16.msra.mxu3 %v1412_v42  ;;  %v1304_v14 = vmax.f32 %v1067_v49, %v1176_v24  ;;  %v1308_v55 = vmax.f32 %v1069_v2, %v1180_v52  ;;  %v1400_v18 = vpack.c.bf16 %v1316_v0, %v1312_v10  ;;  %v1295_v20 = vmax.f32 %v973_v12, %v1167_v15  ;;  %v2502_v42 = vld [vmem:[%s4216_s3 + $0x24] sm:$0xf]  ;;  %v2504_v49 = vld [vmem:[%s4216_s3 + $0x34] sm:$0xf]  ;;  %v4395_v2 = vld [vmem:[#allocation38_spill] sm:$0xff]  ;;  %v3876_v12 = vpop.permute.xlu2 %1525  ;;  %v3920_v15 = vpop.permute.xlu0 %1530 }
 0x1f6   : > { %v1299_v41 = vmax.f32 %v975_v37, %v1171_v58  ;;  %v1395_v17 = vpack.c.bf16 %v1307_v39, %v1303_v31  ;;  %v1296_v32 = vmax.f32 %v1062_v13, %v1168_v54  ;;  %v1300_v5 = vmax.f32 %v1064_v53, %v1172_v56  ;;  %4398 = vst [vmem:[#allocation9_spill] sm:$0xff] %v3876_v12  ;;  %v3882_v13 = vpop.permute.xlu1 %1515  ;;  %v2510_v37 = vld [vmem:[%s4216_s3 + $0x64] sm:$0xf]  ;;  %v2512_v0 = vld [vmem:[%s4216_s3 + $0x74] sm:$0xf] }
 0x1f7   : > { %v1396_v47 = vpack.c.bf16 %v1308_v55, %v1304_v14  ;;  %v3824_v36 = vor.u32 %v2502_v42, %v2436_v11  ;;  %v3838_v35 = vor.u32 %v2504_v49, %v2444_v21  ;;  %v3844_v7 = vpop.f32.mrf.mxu2  ;;  %v3852_v43 = vor.u32 %v2506_v1, %v2452_v46 }
 0x1f8   : > { %1861 = vmatpush.bf16.msra.mxu1 %v1407_v34  ;;  %v1391_v48 = vpack.c.bf16 %v1299_v41, %v1295_v20  ;;  %v1392_v60 = vpack.c.bf16 %v1300_v5, %v1296_v32  ;;  %v3896_v24 = vor.u32 %v2510_v37, %v2468_v29 }
 0x1f9   : > { %1959 = vmatpush.bf16.msra.mxu3 %v1408_v44  ;;  %v2508_v44 = vld [vmem:[%s4216_s3 + $0x54] sm:$0xf] }
 0x1fa   : > { %v3872_v50 = vor.u32 %v2508_v44, %v2460_v57 }
 0x1fb   : > { %1675 = vmatmul.bf16.gmra.mxu1 %v3810_v28  ;;  %1822 = vmatmul.bf16.gmra.mxu0 %v4393_v3 }
 0x1fc   : > { %1862 = vmatpush.bf16.msra.mxu1 %v1403_v62  ;;  %1773 = vmatmul.bf16.gmra.mxu3 %v3810_v28  ;;  %v1624_v25 = vpop.f32.mrf.mxu0 }
 0x1fd   : > { %1960 = vmatpush.bf16.msra.mxu3 %v1404_v19  ;;  %1920 = vmatmul.bf16.gmra.mxu2 %v4393_v3  ;;  %v3892_v53 = vpop.permute.xlu2 %1520  ;;  %v2476_v19 = vld [vmem:[%s4216_s3 + $0x78] sm:$0xf0]  ;;  %v3936_v3 = vpop.permute.xlu0 %1505 }
 0x1fe   : > { %v3898_v26 = vpop.permute.xlu1 %1510  ;;  %v3922_v54 = vor.u32 %v2512_v0, %v2476_v19 }
 0x1ff   : > { %v3856_v34 = vpop.f32.mrf.mxu2 }
 0x200   : > { %1863 = vmatpush.bf16.msra.mxu1 %v1399_v61 }
 0x201   : > { %1961 = vmatpush.bf16.msra.mxu3 %v1400_v18 }
 0x204   : > { %1864 = vmatpush.bf16.msra.mxu1 %v1395_v17  ;;  %v3854_v51 = vpop.f32.mrf.mxu0 }
 0x205   : > { %1962 = vmatpush.bf16.msra.mxu3 %v1396_v47  ;;  %v3906_v6 = vpop.permute.xlu2 %1495  ;;  %v3943_v20 = vpop.permute.xlu0 %1500 }
 0x206   : > { %4399 = vst [vmem:[#allocation13_spill] sm:$0xff] %v3906_v6  ;;  %v3910_v52 = vpop.permute.xlu1 %1485 }
 0x207   : > { %v3864_v33 = vpop.f32.mrf.mxu2  ;;  %4400 = vst [vmem:[#allocation14_spill] sm:$0xff] %v3910_v52 }
 0x208   : > { %1865 = vmatpush.bf16.msra.mxu1 %v1391_v48 }
 0x209   : > { %1963 = vmatpush.bf16.msra.mxu3 %v1392_v60 }
 0x20b   : > { %1680 = vmatmul.bf16.gmra.mxu1 %v3824_v36  ;;  %1827 = vmatmul.bf16.gmra.mxu0 %v4394_v30 }
 0x20c   : > { %1778 = vmatmul.bf16.gmra.mxu3 %v3824_v36  ;;  %v3862_v59 = vpop.f32.mrf.mxu0 }
 0x20d   : > { %1925 = vmatmul.bf16.gmra.mxu2 %v4394_v30  ;;  %v3952_v11 = vpop.permute.xlu0 %1475 }
 0x20e   : > { %v3930_v31 = vpop.permute.xlu1 %1480  ;;  %4403 = vst [vmem:[#allocation17_spill] sm:$0xff] %v3952_v11 }
 0x20f   : > { %v3884_v40 = vpop.f32.mrf.mxu2  ;;  %4402 = vst [vmem:[#allocation15_spill] sm:$0xff] %v3930_v31 }
 0x214   : > { %v3880_v8 = vpop.f32.mrf.mxu0 }
 0x215   : > { %v3966_v37 = vpop.permute.xlu0 %1470 }
 0x216   : > { %v3940_v56 = vpop.permute.xlu1 %1455  ;;  %v1630_v0 = vadd.f32 %v3862_v59, %v3966_v37 }
 0x217   : > { %v3900_v45 = vpop.f32.mrf.mxu2  ;;  %v1623_v14 = vadd.f32 %v1622_v23, %v3940_v56 }
 0x21b   : > { %1685 = vmatmul.bf16.gmra.mxu1 %v3838_v35  ;;  %1832 = vmatmul.bf16.gmra.mxu0 %v4395_v2 }
 0x21c   : > { %1783 = vmatmul.bf16.gmra.mxu3 %v3838_v35  ;;  %v3894_v4 = vpop.f32.mrf.mxu0 }
 0x21d   : > { %1930 = vmatmul.bf16.gmra.mxu2 %v4395_v2 }
 0x21f   : > { %v3912_v10 = vpop.f32.mrf.mxu2 }
 0x224   : > { %v3908_v62 = vpop.f32.mrf.mxu0 }
 0x227   : > { %v3932_v39 = vpop.f32.mrf.mxu2 }
 0x22b   : > { %1690 = vmatmul.bf16.gmra.mxu1 %v3852_v43  ;;  %1837 = vmatmul.bf16.gmra.mxu0 %v4396_v63 }
 0x22c   : > { %1788 = vmatmul.bf16.gmra.mxu3 %v3852_v43  ;;  %v3926_v58 = vpop.f32.mrf.mxu0 }
 0x22d   : > { %1935 = vmatmul.bf16.gmra.mxu2 %v4396_v63 }
 0x234   : > { %v3956_v21 = vpop.f32.mrf.mxu0 }
 0x23b   : > { %1695 = vmatmul.bf16.gmra.mxu1 %v3872_v50  ;;  %1842 = vmatmul.bf16.gmra.mxu0 %v4397_v9 }
 0x23c   : > { %1793 = vmatmul.bf16.gmra.mxu3 %v3872_v50 }
 0x23d   : > { %1940 = vmatmul.bf16.gmra.mxu2 %v4397_v9 }
 0x24b   : > { %1700 = vmatmul.bf16.gmra.mxu1 %v3896_v24  ;;  %1847 = vmatmul.bf16.gmra.mxu0 %v3577_v16 }
 0x24c   : > { %1798 = vmatmul.bf16.gmra.mxu3 %v3896_v24 }
 0x24d   : > { %1945 = vmatmul.bf16.gmra.mxu2 %v3577_v16  ;;  %v3924_v16 = vpop.permute.xlu2 %1490 }
 0x24e   : > { %4401 = vst [vmem:[#allocation11_spill] sm:$0xff] %v3924_v16 }
 0x255   : > { %v3938_v61 = vpop.permute.xlu2 %1465 }
 0x256   : > { %v1628_v23 = vadd.f32 %v3854_v51, %v3938_v61  ;;  %v1726_v51 = vadd.f32 %v3856_v34, %v3938_v61  ;;  %v1633_v34 = vadd.f32 %v3880_v8, %v3952_v11 }
 0x25b   : > { %1705 = vmatmul.bf16.gmra.mxu1 %v3922_v54  ;;  %1852 = vmatmul.bf16.gmra.mxu0 %v3657_v27 }
 0x25c   : > { %1803 = vmatmul.bf16.gmra.mxu3 %v3922_v54 }
 0x25d   : > { %1950 = vmatmul.bf16.gmra.mxu2 %v3657_v27  ;;  %v3947_v41 = vpop.permute.xlu2 %1460  ;;  %v1721_v27 = vadd.f32 %v3836_v22, %v3940_v56 }
 0x25e   : > { %v1625_v17 = vadd.f32 %v1624_v25, %v3947_v41 }
 0x268   : > { %v1671_v55 = vpop.f32.mrf.mxu1 }
 0x269   : > { %v1672_v18 = vadd.f32 %v1671_v55, %v1623_v14  ;;  %v3974_v14 = vpop.f32.mrf.mxu0 }
 0x26b   : > { %1866 = vmatmul.bf16.vlgmr.msra.gmra.mxu1 %v3732_v38  ;;  %v2005_v48 = vmul.f32 0.2, %v1672_v18 }
 0x26c   : > { %1964 = vmatmul.bf16.vlgmr.msra.gmra.mxu3 %v3732_v38  ;;  %v1723_v38 = vadd.f32 %v3844_v7, %v3947_v41  ;;  %v3964_v7 = vpop.f32.mrf.mxu2 }
 0x26d   : > { %v2069_v30 = vmax.f32 %v1672_v18, %v2005_v48 }
 0x26f   : > { %v1769_v32 = vpop.f32.mrf.mxu3 }
 0x270   : > { %v1770_v5 = vadd.f32 %v1769_v32, %v1721_v27  ;;  %v1673_v47 = vpop.f32.mrf.mxu1 }
 0x271   : > { %v1674_v60 = vadd.f32 %v1673_v47, %v1625_v17  ;;  %v1728_v47 = vadd.f32 %v3864_v33, %v3966_v37  ;;  %v1731_v33 = vadd.f32 %v3884_v40, %v3952_v11  ;;  %v1733_v40 = vadd.f32 %v3900_v45, %v3930_v31 }
 0x272   : > { %v2006_v25 = vmul.f32 0.2, %v1770_v5  ;;  %v1736_v45 = vadd.f32 %v3912_v10, %v3910_v52  ;;  %v1643_v10 = vadd.f32 %v3956_v21, %v3906_v6 }
 0x273   : > { %v2009_v42 = vmul.f32 0.2, %v1674_v60 }
 0x274   : > { %v2070_v57 = vmax.f32 %v1770_v5, %v2006_v25  ;;  %v3980_v48 = vpop.f32.mrf.mxu2 }
 0x275   : > { %v2073_v49 = vmax.f32 %v1674_v60, %v2009_v42 }
 0x277   : > { %v1771_v22 = vpop.f32.mrf.mxu3  ;;  %v3960_v2 = vpack.c.bf16 %v2073_v49, %v2069_v30 }
 0x278   : > { %v1772_v1 = vadd.f32 %v1771_v22, %v1723_v38  ;;  %v1676_v46 = vpop.f32.mrf.mxu1 }
 0x279   : > { %v1677_v63 = vadd.f32 %v1676_v46, %v1628_v23  ;;  %v3984_v23 = vpop.f32.mrf.mxu0  ;;  %v1635_v46 = vadd.f32 %v3894_v4, %v3930_v31 }
 0x27a   : > { %v2010_v44 = vmul.f32 0.2, %v1772_v1 }
 0x27b   : > { %1871 = vmatmul.bf16.gmra.mxu1 %v3810_v28  ;;  %v2013_v27 = vmul.f32 0.2, %v1677_v63 }
 0x27c   : > { %v2074_v9 = vmax.f32 %v1772_v1, %v2010_v44  ;;  %1969 = vmatmul.bf16.gmra.mxu3 %v3810_v28 }
 0x27d   : > { %v2077_v32 = vmax.f32 %v1677_v63, %v2013_v27  ;;  %v1638_v27 = vadd.f32 %v3908_v62, %v3910_v52 }
 0x27e   : > { %v3970_v29 = vpack.c.bf16 %v2074_v9, %v2070_v57  ;;  %v3994_v9 = vpop.f32.mrf.mxu2 }
 0x27f   : > { %v1774_v19 = vpop.f32.mrf.mxu3 }
 0x280   : > { %4404 = vst [vmem:[#allocation12_spill] sm:$0xff] %v3970_v29  ;;  %v1775_v55 = vadd.f32 %v1774_v19, %v1726_v51  ;;  %v1678_v18 = vpop.f32.mrf.mxu1 }
 0x281   : > { %v1679_v17 = vadd.f32 %v1678_v18, %v1630_v0 }
 0x282   : > { %v2014_v42 = vmul.f32 0.2, %v1775_v55 }
 0x283   : > { %v2017_v28 = vmul.f32 0.2, %v1679_v17 }
 0x284   : > { %v2078_v25 = vmax.f32 %v1775_v55, %v2014_v42  ;;  %v3996_v55 = vpop.f32.mrf.mxu0 }
 0x285   : > { %v2081_v5 = vmax.f32 %v1679_v17, %v2017_v28 }
 0x287   : > { %v1776_v60 = vpop.f32.mrf.mxu3  ;;  %v3982_v59 = vpack.c.bf16 %v2081_v5, %v2077_v32 }
 0x288   : > { %v1777_v30 = vadd.f32 %v1776_v60, %v1728_v47  ;;  %v1681_v49 = vpop.f32.mrf.mxu1  ;;  %v4004_v60 = vpop.f32.mrf.mxu2 }
 0x289   : > { %v1682_v38 = vadd.f32 %v1681_v49, %v1633_v34 }
 0x28a   : > { %v2018_v22 = vmul.f32 0.2, %v1777_v30 }
 0x28b   : > { %1876 = vmatmul.bf16.gmra.mxu1 %v3824_v36  ;;  %v2021_v51 = vmul.f32 0.2, %v1682_v38 }
 0x28c   : > { %v2082_v1 = vmax.f32 %v1777_v30, %v2018_v22  ;;  %1974 = vmatmul.bf16.gmra.mxu3 %v3824_v36  ;;  %v1652_v62 = vpop.f32.mrf.mxu0 }
 0x28d   : > { %v2085_v18 = vmax.f32 %v1682_v38, %v2021_v51  ;;  %v1640_v38 = vadd.f32 %v3926_v58, %v3924_v16 }
 0x28e   : > { %v3990_v8 = vpack.c.bf16 %v2082_v1, %v2078_v25 }
 0x28f   : > { %v1779_v63 = vpop.f32.mrf.mxu3 }
 0x290   : > { %4405 = vst [vmem:[#allocation19_spill] sm:$0xff] %v3990_v8  ;;  %v1780_v44 = vadd.f32 %v1779_v63, %v1731_v33  ;;  %v1683_v57 = vpop.f32.mrf.mxu1 }
 0x291   : > { %v1684_v0 = vadd.f32 %v1683_v57, %v1635_v46  ;;  %v4014_v57 = vpop.f32.mrf.mxu2 }
 0x292   : > { %v2022_v28 = vmul.f32 0.2, %v1780_v44 }
 0x293   : > { %v2025_v19 = vmul.f32 0.2, %v1684_v0 }
 0x294   : > { %v2086_v42 = vmax.f32 %v1780_v44, %v2022_v28  ;;  %v1654_v58 = vpop.f32.mrf.mxu0 }
 0x295   : > { %v2089_v36 = vmax.f32 %v1684_v0, %v2025_v19 }
 0x297   : > { %v1781_v17 = vpop.f32.mrf.mxu3  ;;  %v4002_v4 = vpack.c.bf16 %v2089_v36, %v2085_v18 }
 0x298   : > { %v1782_v32 = vadd.f32 %v1781_v17, %v1733_v40  ;;  %v1686_v5 = vpop.f32.mrf.mxu1 }
 0x299   : > { %v1687_v47 = vadd.f32 %v1686_v5, %v1638_v27  ;;  %v1752_v5 = vpop.f32.mrf.mxu2 }
 0x29a   : > { %v2026_v34 = vmul.f32 0.2, %v1782_v32 }
 0x29b   : > { %1881 = vmatmul.bf16.gmra.mxu1 %v3838_v35  ;;  %v2029_v33 = vmul.f32 0.2, %v1687_v47 }
 0x29c   : > { %v2090_v30 = vmax.f32 %v1782_v32, %v2026_v34  ;;  %1979 = vmatmul.bf16.gmra.mxu3 %v3838_v35  ;;  %v1738_v35 = vadd.f32 %v3932_v39, %v3924_v16  ;;  %v1741_v39 = vadd.f32 %v3964_v7, %v3906_v6  ;;  %v1650_v16 = vadd.f32 %v3996_v55, %v3898_v26 }
 0x29d   : > { %v2093_v44 = vmax.f32 %v1687_v47, %v2029_v33 }
 0x29e   : > { %v4010_v49 = vpack.c.bf16 %v2090_v30, %v2086_v42  ;;  %v1657_v30 = vpop.f32.mrf.mxu0 }
 0x29f   : > { %v1784_v22 = vpop.f32.mrf.mxu3 }
 0x2a0   : > { %v1785_v25 = vadd.f32 %v1784_v22, %v1736_v45  ;;  %v1688_v1 = vpop.f32.mrf.mxu1 }
 0x2a1   : > { %v1689_v46 = vadd.f32 %v1688_v1, %v1640_v38  ;;  %v1755_v22 = vpop.f32.mrf.mxu2 }
 0x2a2   : > { %v2030_v18 = vmul.f32 0.2, %v1785_v25 }
 0x2a3   : > { %v2033_v63 = vmul.f32 0.2, %v1689_v46 }
 0x2a4   : > { %v2094_v28 = vmax.f32 %v1785_v25, %v2030_v18 }
 0x2a5   : > { %v2097_v51 = vmax.f32 %v1689_v46, %v2033_v63 }
 0x2a6   : > { %v1659_v25 = vpop.f32.mrf.mxu0 }
 0x2a7   : > { %v1786_v0 = vpop.f32.mrf.mxu3  ;;  %v4020_v19 = vpack.c.bf16 %v2097_v51, %v2093_v44 }
 0x2a8   : > { %v1787_v36 = vadd.f32 %v1786_v0, %v1738_v35  ;;  %v1691_v40 = vpop.f32.mrf.mxu1 }
 0x2a9   : > { %v4022_v27 = vadd.f32 %v1691_v40, %v1643_v10  ;;  %v1757_v1 = vpop.f32.mrf.mxu2  ;;  %v1658_v40 = vadd.f32 %v1657_v30, %v3876_v12 }
 0x2aa   : > { %v2034_v17 = vmul.f32 0.2, %v1787_v36 }
 0x2ab   : > { %1886 = vmatmul.bf16.gmra.mxu1 %v3852_v43 }
 0x2ac   : > { %v2098_v32 = vmax.f32 %v1787_v36, %v2034_v17  ;;  %1984 = vmatmul.bf16.gmra.mxu3 %v3852_v43 }
 0x2ae   : > { %v4028_v21 = vpack.c.bf16 %v2098_v32, %v2094_v28  ;;  %v1818_v33 = vpop.f32.mrf.mxu0  ;;  %v1653_v28 = vadd.f32 %v1652_v62, %v3882_v13  ;;  %v1660_v32 = vadd.f32 %v1659_v25, %v3920_v15  ;;  %v1645_v25 = vadd.f32 %v3974_v14, %v3943_v20 }
 0x2af   : > { %v1789_v47 = vpop.f32.mrf.mxu3 }
 0x2b0   : > { %v4030_v34 = vadd.f32 %v1789_v47, %v1741_v39  ;;  %v1693_v42 = vpop.f32.mrf.mxu1 }
 0x2b1   : > { %v4040_v44 = vpop.f32.mrf.mxu2 }
 0x2b6   : > { %v4042_v35 = vpop.f32.mrf.mxu0 }
 0x2b7   : > { %v4032_v45 = vpop.f32.mrf.mxu3 }
 0x2b8   : > { %v1696_v38 = vpop.f32.mrf.mxu1 }
 0x2b9   : > { %v4044_v0 = vpop.f32.mrf.mxu2 }
 0x2bb   : > { %1891 = vmatmul.bf16.gmra.mxu1 %v3872_v50 }
 0x2bc   : > { %1989 = vmatmul.bf16.gmra.mxu3 %v3872_v50 }
 0x2be   : > { %v4046_v36 = vpop.f32.mrf.mxu0 }
 0x2bf   : > { %v4036_v43 = vpop.f32.mrf.mxu3 }
 0x2c0   : > { %v1698_v7 = vpop.f32.mrf.mxu1 }
 0x2c1   : > { %v4056_v52 = vpop.f32.mrf.mxu2 }
 0x2c7   : > { %v1796_v46 = vpop.f32.mrf.mxu3 }
 0x2c8   : > { %v1701_v63 = vpop.f32.mrf.mxu1 }
 0x2c9   : > { %v1702_v30 = vadd.f32 %v1701_v63, %v1653_v28 }
 0x2cb   : > { %1896 = vmatmul.bf16.gmra.mxu1 %v3896_v24  ;;  %v2053_v63 = vmul.f32 0.2, %v1702_v30 }
 0x2cc   : > { %1994 = vmatmul.bf16.gmra.mxu3 %v3896_v24  ;;  %v1655_v24 = vadd.f32 %v1654_v58, %v3892_v53  ;;  %v1648_v58 = vadd.f32 %v3984_v23, %v3936_v3  ;;  %v1758_v23 = vadd.f32 %v1757_v1, %v3920_v15  ;;  %v1746_v1 = vadd.f32 %v3994_v9, %v3936_v3 }
 0x2cd   : > { %v2037_v9 = vmul.f32 0.2, %v4022_v27 }
 0x2ce   : > { %v1697_v8 = vadd.f32 %v1696_v38, %v1648_v58  ;;  %v2117_v58 = vmax.f32 %v1702_v30, %v2053_v63 }
 0x2cf   : > { %v1799_v51 = vpop.f32.mrf.mxu3 }
 0x2d0   : > { %v1703_v10 = vpop.f32.mrf.mxu1 }
 0x2d1   : > { %v1704_v39 = vadd.f32 %v1703_v10, %v1655_v24  ;;  %v1753_v10 = vadd.f32 %v1752_v5, %v3892_v53  ;;  %v4064_v24 = vpop.f32.mrf.mxu0 }
 0x2d3   : > { %v2057_v62 = vmul.f32 0.2, %v1704_v39 }
 0x2d5   : > { %v2121_v14 = vmax.f32 %v1704_v39, %v2057_v62  ;;  %v1743_v39 = vadd.f32 %v3980_v48, %v3943_v20  ;;  %v4076_v62 = vpop.f32.mrf.mxu2 }
 0x2d7   : > { %v1801_v50 = vpop.f32.mrf.mxu3  ;;  %v1792_v48 = vadd.f32 %v4032_v45, %v1743_v39 }
 0x2d8   : > { %v1706_v18 = vpop.f32.mrf.mxu1 }
 0x2d9   : > { %v1707_v17 = vadd.f32 %v1706_v18, %v1658_v40  ;;  %v1699_v18 = vadd.f32 %v1698_v7, %v1650_v16  ;;  %v1819_v16 = vadd.f32 %v1818_v33, %v3940_v56  ;;  %v1802_v7 = vadd.f32 %v1801_v50, %v1753_v10 }
 0x2da   : > { %v2042_v45 = vmul.f32 0.2, %v1792_v48 }
 0x2db   : > { %1901 = vmatmul.bf16.gmra.mxu1 %v3922_v54  ;;  %v2061_v31 = vmul.f32 0.2, %v1707_v17 }
 0x2dc   : > { %1999 = vmatmul.bf16.gmra.mxu3 %v3922_v54  ;;  %v1756_v54 = vadd.f32 %v1755_v22, %v3876_v12  ;;  %v1751_v22 = vadd.f32 %v4014_v57, %v3882_v13  ;;  %v2049_v12 = vmul.f32 0.2, %v1699_v18 }
 0x2dd   : > { %v2125_v28 = vmax.f32 %v1707_v17, %v2061_v31  ;;  %v2045_v17 = vmul.f32 0.2, %v1697_v8 }
 0x2de   : > { %v1800_v38 = vadd.f32 %v1799_v51, %v1751_v22  ;;  %v2113_v51 = vmax.f32 %v1699_v18, %v2049_v12 }
 0x2df   : > { %v1804_v47 = vpop.f32.mrf.mxu3 }
 0x2e0   : > { %v1708_v6 = vpop.f32.mrf.mxu1  ;;  %v1805_v55 = vadd.f32 %v1804_v47, %v1756_v54  ;;  %v1748_v47 = vadd.f32 %v4004_v60, %v3898_v26  ;;  %v2054_v10 = vmul.f32 0.2, %v1800_v38 }
 0x2e1   : > { %v1709_v29 = vadd.f32 %v1708_v6, %v1660_v32  ;;  %v1694_v32 = vadd.f32 %v1693_v42, %v1645_v25  ;;  %v2058_v42 = vmul.f32 0.2, %v1802_v7  ;;  %v1795_v25 = vadd.f32 %v4036_v43, %v1746_v1 }
 0x2e2   : > { %v2062_v54 = vmul.f32 0.2, %v1805_v55  ;;  %v1797_v33 = vadd.f32 %v1796_v46, %v1748_v47  ;;  %v2109_v46 = vmax.f32 %v1697_v8, %v2045_v17  ;;  %v1821_v43 = vadd.f32 %v4042_v35, %v3947_v41  ;;  %v1926_v17 = vpop.f32.mrf.mxu2 }
 0x2e3   : > { %v2065_v40 = vmul.f32 0.2, %v1709_v29  ;;  %v2041_v60 = vmul.f32 0.2, %v1694_v32  ;;  %v2122_v22 = vmax.f32 %v1802_v7, %v2058_v42  ;;  %v2101_v8 = vmax.f32 %v4022_v27, %v2037_v9 }
 0x2e4   : > { %v2126_v30 = vmax.f32 %v1805_v55, %v2062_v54  ;;  %v2038_v35 = vmul.f32 0.2, %v4030_v34  ;;  %v1919_v1 = vadd.f32 %v4044_v0, %v3947_v41  ;;  %v2106_v27 = vmax.f32 %v1792_v48, %v2042_v45  ;;  %v4409_v45 = vld [vmem:[#allocation15_spill] sm:$0xff] }
 0x2e5   : > { %v2129_v6 = vmax.f32 %v1709_v29, %v2065_v40  ;;  %v2157_v40 = vpack.c.bf16 %v2121_v14, %v2117_v58  ;;  %v2105_v18 = vmax.f32 %v1694_v32, %v2041_v60  ;;  %v2118_v14 = vmax.f32 %v1800_v38, %v2054_v10 }
 0x2e7   : > { %v2161_v11 = vpack.c.bf16 %v2129_v6, %v2125_v28  ;;  %v1806_v5 = vpop.f32.mrf.mxu3  ;;  %v4082_v28 = vpop.f32.mrf.mxu0  ;;  %v2050_v6 = vmul.f32 0.2, %v1797_v33  ;;  %v2158_v7 = vpack.c.bf16 %v2122_v22, %v2118_v14 }
 0x2e8   : > { %v1807_v31 = vadd.f32 %v1806_v5, %v1758_v23  ;;  %v1867_v29 = vpop.f32.mrf.mxu1  ;;  %v2153_v23 = vpack.c.bf16 %v2113_v51, %v2109_v46  ;;  %v2102_v51 = vmax.f32 %v4030_v34, %v2038_v35  ;;  %v1826_v34 = vadd.f32 %v4064_v24, %v3966_v37  ;;  %v4111_v24 = vld [vmem:[%s4218_s5] sm:$0xf] }
 0x2e9   : > { %v1868_v57 = vadd.f32 %v1867_v29, %v1819_v16  ;;  %2166 = vmatpush.bf16.msrb.mxu0 %v2161_v11  ;;  %v1917_v11 = vadd.f32 %v4040_v44, %v3940_v56  ;;  %v2046_v16 = vmul.f32 0.2, %v1795_v25  ;;  %v2114_v54 = vmax.f32 %v1797_v33, %v2050_v6 }
 0x2ea   : > { %v2066_v50 = vmul.f32 0.2, %v1807_v31  ;;  %v2149_v29 = vpack.c.bf16 %v2105_v18, %v2101_v8  ;;  %v2150_v41 = vpack.c.bf16 %v2106_v27, %v2102_v51  ;;  %v1928_v9 = vpop.f32.mrf.mxu2 }
 0x2eb   : > { %v2007_v5 = vmul.f32 0.2, %v1868_v57  ;;  %v2110_v32 = vmax.f32 %v1795_v25, %v2046_v16  ;;  %v4407_v16 = vld [vmem:[#allocation19_spill] sm:$0xff] }
 0x2ec   : > { %v2130_v63 = vmax.f32 %v1807_v31, %v2066_v50  ;;  %v1824_v50 = vadd.f32 %v4046_v36, %v3938_v61  ;;  %v1922_v36 = vadd.f32 %v4056_v52, %v3938_v61 }
 0x2ed   : > { %2167 = vmatpush.bf16.msrb.mxu0 %v2157_v40  ;;  %v2071_v58 = vmax.f32 %v1868_v57, %v2007_v5  ;;  %v2154_v42 = vpack.c.bf16 %v2114_v54, %v2110_v32 }
 0x2ee   : > { %v2162_v12 = vpack.c.bf16 %v2130_v63, %v2126_v30 }
 0x2ef   : > { %v1965_v55 = vpop.f32.mrf.mxu3  ;;  %v1830_v60 = vpop.f32.mrf.mxu0 }
 0x2f0   : > { %v1966_v56 = vadd.f32 %v1965_v55, %v1917_v11  ;;  %2179 = vmatpush.bf16.msrb.mxu1 %v2162_v12  ;;  %v1869_v44 = vpop.f32.mrf.mxu1  ;;  %v1831_v54 = vadd.f32 %v1830_v60, %v4409_v45 }
 0x2f1   : > { %v1870_v47 = vadd.f32 %v1869_v44, %v1821_v43  ;;  %2168 = vmatpush.bf16.msrb.mxu0 %v2153_v23  ;;  %v4406_v43 = vld [vmem:[#allocation17_spill] sm:$0xff] }
 0x2f2   : > { %v2008_v40 = vmul.f32 0.2, %v1966_v56  ;;  %v1829_v18 = vadd.f32 %v4082_v28, %v4406_v43 }
 0x2f3   : > { %v2011_v31 = vmul.f32 0.2, %v1870_v47 }
 0x2f4   : > { %2180 = vmatpush.bf16.msrb.mxu1 %v2158_v7  ;;  %v2072_v0 = vmax.f32 %v1966_v56, %v2008_v40 }
 0x2f5   : > { %v2075_v38 = vmax.f32 %v1870_v47, %v2011_v31  ;;  %2169 = vmatpush.bf16.msrb.mxu0 %v2149_v29 }
 0x2f7   : > { %v1967_v33 = vpop.f32.mrf.mxu3  ;;  %v4093_v39 = vpack.c.bf16 %v2075_v38, %v2071_v58  ;;  %v1833_v12 = vpop.f32.mrf.mxu0 }
 0x2f8   : > { %v1968_v25 = vadd.f32 %v1967_v33, %v1919_v1  ;;  %2181 = vmatpush.bf16.msrb.mxu1 %v2154_v42  ;;  %v1872_v57 = vpop.f32.mrf.mxu1  ;;  %v1929_v42 = vadd.f32 %v1928_v9, %v4409_v45  ;;  %v4410_v33 = vld [vmem:[#allocation14_spill] sm:$0xff] }
 0x2f9   : > { %v1873_v10 = vadd.f32 %v1872_v57, %v1824_v50  ;;  %2170 = vmatpush.bf16.msrb.mxu0 %v4020_v19 }
 0x2fa   : > { %v2012_v30 = vmul.f32 0.2, %v1968_v25 }
 0x2fb   : > { %v2015_v6 = vmul.f32 0.2, %v1873_v10 }
 0x2fc   : > { %v2076_v63 = vmax.f32 %v1968_v25, %v2012_v30  ;;  %2182 = vmatpush.bf16.msrb.mxu1 %v2150_v41 }
 0x2fd   : > { %2171 = vmatpush.bf16.msrb.mxu0 %v4002_v4  ;;  %v2079_v52 = vmax.f32 %v1873_v10, %v2015_v6 }
 0x2fe   : > { %v4100_v11 = vpack.c.bf16 %v2076_v63, %v2072_v0 }
 0x2ff   : > { %v1970_v46 = vpop.f32.mrf.mxu3  ;;  %v1835_v8 = vpop.f32.mrf.mxu0 }
 0x300   : > { %v1971_v48 = vadd.f32 %v1970_v46, %v1922_v36  ;;  %2183 = vmatpush.bf16.msrb.mxu1 %v4028_v21  ;;  %v1874_v19 = vpop.f32.mrf.mxu1  ;;  %v1924_v21 = vadd.f32 %v4076_v62, %v3966_v37  ;;  %v4408_v37 = vld [vmem:[#allocation12_spill] sm:$0xff]  ;;  %v1927_v62 = vadd.f32 %v1926_v17, %v4406_v43  ;;  %v1834_v17 = vadd.f32 %v1833_v12, %v4410_v33  ;;  %v4411_v46 = vld [vmem:[#allocation11_spill] sm:$0xff] }
 0x301   : > { %v1875_v22 = vadd.f32 %v1874_v19, %v1826_v34  ;;  %2172 = vmatpush.bf16.msrb.mxu0 %v3982_v59  ;;  %v1836_v9 = vadd.f32 %v1835_v8, %v4411_v46 }
 0x302   : > { %v2016_v23 = vmul.f32 0.2, %v1971_v48 }
 0x303   : > { %v2019_v4 = vmul.f32 0.2, %v1875_v22 }
 0x304   : > { %2184 = vmatpush.bf16.msrb.mxu1 %v4010_v49  ;;  %v2080_v5 = vmax.f32 %v1971_v48, %v2016_v23 }
 0x305   : > { %v2083_v61 = vmax.f32 %v1875_v22, %v2019_v4  ;;  %2173 = vmatpush.bf16.msrb.mxu0 %v3960_v2  ;;  %v1931_v2 = vpop.f32.mrf.mxu2 }
 0x306   : > { %v1932_v36 = vadd.f32 %v1931_v2, %v4410_v33 }
 0x307   : > { %v1972_v59 = vpop.f32.mrf.mxu3  ;;  %v4117_v55 = vpack.c.bf16 %v2083_v61, %v2079_v52  ;;  %v1838_v50 = vpop.f32.mrf.mxu0 }
 0x308   : > { %v1973_v49 = vadd.f32 %v1972_v59, %v1924_v21  ;;  %2185 = vmatpush.bf16.msrb.mxu1 %v4407_v16  ;;  %v1877_v14 = vpop.f32.mrf.mxu1  ;;  %2174 = vmatmul.bf16.vlgmr.msrb.gmra.mxu0 %v4111_v24 }
 0x309   : > { %v1878_v56 = vadd.f32 %v1877_v14, %v1829_v18  ;;  %v4412_v18 = vld [vmem:[#allocation13_spill] sm:$0xff] }
 0x30a   : > { %v2020_v44 = vmul.f32 0.2, %v1973_v49  ;;  %v1839_v59 = vadd.f32 %v1838_v50, %v4412_v18 }
 0x30b   : > { %v2023_v35 = vmul.f32 0.2, %v1878_v56 }
 0x30c   : > { %v2084_v47 = vmax.f32 %v1973_v49, %v2020_v44  ;;  %2186 = vmatpush.bf16.msrb.mxu1 %v4408_v37 }
 0x30d   : > { %v1933_v58 = vpop.f32.mrf.mxu2  ;;  %v2087_v1 = vmax.f32 %v1878_v56, %v2023_v35 }
 0x30e   : > { %v4123_v28 = vpack.c.bf16 %v2084_v47, %v2080_v5  ;;  %v1934_v43 = vadd.f32 %v1933_v58, %v4411_v46 }
 0x30f   : > { %v1975_v7 = vpop.f32.mrf.mxu3  ;;  %2187 = vmatmul.bf16.vlgmr.msrb.gmra.mxu1 %v4111_v24  ;;  %v4135_v19 = vpop.f32.mrf.mxu0 }
 0x310   : > { %v1976_v31 = vadd.f32 %v1975_v7, %v1927_v62  ;;  %v1879_v29 = vpop.f32.mrf.mxu1 }
 0x311   : > { %v1880_v32 = vadd.f32 %v1879_v29, %v1831_v54 }
 0x312   : > { %v2024_v60 = vmul.f32 0.2, %v1976_v31 }
 0x313   : > { %v2027_v38 = vmul.f32 0.2, %v1880_v32 }
 0x314   : > { %v2088_v41 = vmax.f32 %v1976_v31, %v2024_v60 }
 0x315   : > { %v2091_v27 = vmax.f32 %v1880_v32, %v2027_v38  ;;  %v1936_v63 = vpop.f32.mrf.mxu2 }
 0x316   : > { %v1937_v62 = vadd.f32 %v1936_v63, %v4412_v18  ;;  %v4413_v63 = vld [vmem:[#allocation9_spill] sm:$0xff] }
 0x317   : > { %v1977_v51 = vpop.f32.mrf.mxu3  ;;  %v4129_v40 = vpack.c.bf16 %v2091_v27, %v2087_v1  ;;  %v1843_v8 = vpop.f32.mrf.mxu0 }
 0x318   : > { %v1978_v25 = vadd.f32 %v1977_v51, %v1929_v42  ;;  %v1882_v57 = vpop.f32.mrf.mxu1 }
 0x319   : > { %v1883_v10 = vadd.f32 %v1882_v57, %v1834_v17 }
 0x31a   : > { %v2028_v30 = vmul.f32 0.2, %v1978_v25 }
 0x31b   : > { %v2031_v12 = vmul.f32 0.2, %v1883_v10 }
 0x31c   : > { %v2092_v0 = vmax.f32 %v1978_v25, %v2028_v30 }
 0x31d   : > { %v2095_v61 = vmax.f32 %v1883_v10, %v2031_v12  ;;  %v4139_v23 = vpop.f32.mrf.mxu2 }
 0x31e   : > { %v4132_v34 = vpack.c.bf16 %v2092_v0, %v2088_v41 }
 0x31f   : > { %v1980_v48 = vpop.f32.mrf.mxu3  ;;  %v1845_v35 = vpop.f32.mrf.mxu0 }
 0x320   : > { %v1981_v6 = vadd.f32 %v1980_v48, %v1932_v36  ;;  %v1884_v22 = vpop.f32.mrf.mxu1 }
 0x321   : > { %v1885_v4 = vadd.f32 %v1884_v22, %v1836_v9 }
 0x322   : > { %v2032_v14 = vmul.f32 0.2, %v1981_v6 }
 0x323   : > { %v2035_v52 = vmul.f32 0.2, %v1885_v4 }
 0x324   : > { %v2096_v47 = vmax.f32 %v1981_v6, %v2032_v14 }
 0x325   : > { %v2099_v21 = vmax.f32 %v1885_v4, %v2035_v52  ;;  %v1941_v29 = vpop.f32.mrf.mxu2 }
 0x327   : > { %v1982_v49 = vpop.f32.mrf.mxu3  ;;  %v4141_v16 = vpack.c.bf16 %v2099_v21, %v2095_v61  ;;  %v1848_v1 = vpop.f32.mrf.mxu0  ;;  %v1846_v61 = vadd.f32 %v1845_v35, %v3898_v26 }
 0x328   : > { %v1983_v2 = vadd.f32 %v1982_v49, %v1934_v43  ;;  %v1887_v56 = vpop.f32.mrf.mxu1  ;;  %v1849_v6 = vadd.f32 %v1848_v1, %v3882_v13  ;;  %v1844_v49 = vadd.f32 %v1843_v8, %v3936_v3 }
 0x329   : > { %v4143_v44 = vadd.f32 %v1887_v56, %v1839_v59 }
 0x32a   : > { %v2036_v5 = vmul.f32 0.2, %v1983_v2 }
 0x32c   : > { %v2100_v37 = vmax.f32 %v1983_v2, %v2036_v5 }
 0x32d   : > { %v1943_v38 = vpop.f32.mrf.mxu2 }
 0x32e   : > { %v4146_v45 = vpack.c.bf16 %v2100_v37, %v2096_v47  ;;  %v1841_v47 = vadd.f32 %v4135_v19, %v3943_v20 }
 0x32f   : > { %v1985_v54 = vpop.f32.mrf.mxu3  ;;  %v1850_v17 = vpop.f32.mrf.mxu0 }
 0x330   : > { %v4148_v7 = vadd.f32 %v1985_v54, %v1937_v62  ;;  %v1889_v31 = vpop.f32.mrf.mxu1  ;;  %v1851_v9 = vadd.f32 %v1850_v17, %v3892_v53 }
 0x331   : > { %v1890_v8 = vadd.f32 %v1889_v31, %v1841_v47 }
 0x333   : > { %v2043_v31 = vmul.f32 0.2, %v1890_v8 }
 0x335   : > { %v1946_v50 = vpop.f32.mrf.mxu2 }
 0x337   : > { %v4150_v32 = vpop.f32.mrf.mxu3  ;;  %v1853_v10 = vpop.f32.mrf.mxu0 }
 0x338   : > { %v1892_v58 = vpop.f32.mrf.mxu1  ;;  %v1854_v36 = vadd.f32 %v1853_v10, %v4413_v63 }
 0x339   : > { %v1893_v54 = vadd.f32 %v1892_v58, %v1844_v49 }
 0x33d   : > { %v1948_v60 = vpop.f32.mrf.mxu2 }
 0x33e   : > { %v1949_v37 = vadd.f32 %v1948_v60, %v3892_v53  ;;  %v2047_v60 = vmul.f32 0.2, %v1893_v54 }
 0x33f   : > { %v1990_v27 = vpop.f32.mrf.mxu3  ;;  %v1855_v46 = vpop.f32.mrf.mxu0 }
 0x340   : > { %v1894_v42 = vpop.f32.mrf.mxu1  ;;  %v1856_v22 = vadd.f32 %v1855_v46, %v3920_v15 }
 0x341   : > { %v1895_v2 = vadd.f32 %v1894_v42, %v1846_v61  ;;  %v2107_v61 = vmax.f32 %v1890_v8, %v2043_v31 }
 0x345   : > { %v1951_v0 = vpop.f32.mrf.mxu2 }
 0x346   : > { %v1952_v59 = vadd.f32 %v1951_v0, %v4413_v63 }
 0x347   : > { %v1992_v33 = vpop.f32.mrf.mxu3 }
 0x348   : > { %v1897_v51 = vpop.f32.mrf.mxu1 }
 0x349   : > { %v1898_v21 = vadd.f32 %v1897_v51, %v1849_v6  ;;  %v1947_v51 = vadd.f32 %v1946_v50, %v3882_v13 }
 0x34b   : > { %v2055_v1 = vmul.f32 0.2, %v1898_v21 }
 0x34d   : > { %v1953_v14 = vpop.f32.mrf.mxu2  ;;  %v2119_v58 = vmax.f32 %v1898_v21, %v2055_v1 }
 0x34f   : > { %v1995_v25 = vpop.f32.mrf.mxu3 }
 0x350   : > { %v1899_v57 = vpop.f32.mrf.mxu1  ;;  %v1996_v19 = vadd.f32 %v1995_v25, %v1947_v51  ;;  %v2039_v25 = vmul.f32 0.2, %v4143_v44 }
 0x351   : > { %v1900_v12 = vadd.f32 %v1899_v57, %v1851_v9  ;;  %v1954_v57 = vadd.f32 %v1953_v14, %v3920_v15  ;;  %v1942_v9 = vadd.f32 %v1941_v29, %v3936_v3  ;;  %v1939_v15 = vadd.f32 %v4139_v23, %v3943_v20 }
 0x352   : > { %v2103_v23 = vmax.f32 %v4143_v44, %v2039_v25  ;;  %v2040_v14 = vmul.f32 0.2, %v4148_v7 }
 0x353   : > { %v2059_v56 = vmul.f32 0.2, %v1900_v12 }
 0x354   : > { %v2151_v49 = vpack.c.bf16 %v2107_v61, %v2103_v23 }
 0x355   : > { %v2123_v42 = vmax.f32 %v1900_v12, %v2059_v56  ;;  %v2056_v12 = vmul.f32 0.2, %v1996_v19 }
 0x357   : > { %v1997_v30 = vpop.f32.mrf.mxu3  ;;  %v2159_v6 = vpack.c.bf16 %v2123_v42, %v2119_v58  ;;  %v2120_v20 = vmax.f32 %v1996_v19, %v2056_v12 }
 0x358   : > { %v1902_v41 = vpop.f32.mrf.mxu1  ;;  %v1998_v10 = vadd.f32 %v1997_v30, %v1949_v37 }
 0x359   : > { %v1903_v48 = vadd.f32 %v1902_v41, %v1854_v36  ;;  %v2051_v41 = vmul.f32 0.2, %v1895_v2  ;;  %v1944_v36 = vadd.f32 %v1943_v38, %v3898_v26 }
 0x35a   : > { %v2060_v13 = vmul.f32 0.2, %v1998_v10 }
 0x35b   : > { %v2063_v43 = vmul.f32 0.2, %v1903_v48  ;;  %v2115_v30 = vmax.f32 %v1895_v2, %v2051_v41 }
 0x35c   : > { %v2124_v29 = vmax.f32 %v1998_v10, %v2060_v13 }
 0x35d   : > { %v2127_v35 = vmax.f32 %v1903_v48, %v2063_v43  ;;  %v1993_v48 = vadd.f32 %v1992_v33, %v1944_v36 }
 0x35f   : > { %v2000_v4 = vpop.f32.mrf.mxu3  ;;  %v2052_v3 = vmul.f32 0.2, %v1993_v48 }
 0x360   : > { %v1904_v52 = vpop.f32.mrf.mxu1  ;;  %v2001_v62 = vadd.f32 %v2000_v4, %v1952_v59  ;;  %v2111_v4 = vmax.f32 %v1893_v54, %v2047_v60  ;;  %v2160_v59 = vpack.c.bf16 %v2124_v29, %v2120_v20 }
 0x361   : > { %v1905_v18 = vadd.f32 %v1904_v52, %v1856_v22  ;;  %v1991_v22 = vadd.f32 %v1990_v27, %v1942_v9  ;;  %v1988_v52 = vadd.f32 %v4150_v32, %v1939_v15 }
 0x362   : > { %v2064_v46 = vmul.f32 0.2, %v2001_v62  ;;  %v2155_v21 = vpack.c.bf16 %v2115_v30, %v2111_v4 }
 0x363   : > { %v2067_v5 = vmul.f32 0.2, %v1905_v18  ;;  %v2048_v43 = vmul.f32 0.2, %v1991_v22  ;;  %v2044_v27 = vmul.f32 0.2, %v1988_v52 }
 0x364   : > { %v2128_v26 = vmax.f32 %v2001_v62, %v2064_v46 }
 0x365   : > { %v2131_v17 = vmax.f32 %v1905_v18, %v2067_v5  ;;  %v2116_v18 = vmax.f32 %v1993_v48, %v2052_v3  ;;  %v2112_v32 = vmax.f32 %v1991_v22, %v2048_v43  ;;  %v2108_v2 = vmax.f32 %v1988_v52, %v2044_v27 }
 0x366   : > { %v2104_v5 = vmax.f32 %v4148_v7, %v2040_v14 }
 0x367   : > { %v2163_v0 = vpack.c.bf16 %v2131_v17, %v2127_v35  ;;  %v2002_v63 = vpop.f32.mrf.mxu3  ;;  %v2156_v56 = vpack.c.bf16 %v2116_v18, %v2112_v32 }
 0x368   : > { %v2003_v53 = vadd.f32 %v2002_v63, %v1954_v57  ;;  %v2152_v44 = vpack.c.bf16 %v2108_v2, %v2104_v5 }
 0x369   : > { %2192 = vmatpush.bf16.msrb.mxu2 %v2163_v0 }
 0x36a   : > { %v2068_v50 = vmul.f32 0.2, %v2003_v53 }
 0x36c   : > { %v2132_v38 = vmax.f32 %v2003_v53, %v2068_v50 }
 0x36d   : > { %2193 = vmatpush.bf16.msrb.mxu2 %v2159_v6 }
 0x36e   : > { %v2164_v33 = vpack.c.bf16 %v2132_v38, %v2128_v26 }
 0x370   : > { %2205 = vmatpush.bf16.msrb.mxu3 %v2164_v33 }
 0x371   : > { %2194 = vmatpush.bf16.msrb.mxu2 %v2155_v21 }
 0x374   : > { %2206 = vmatpush.bf16.msrb.mxu3 %v2160_v59 }
 0x375   : > { %2195 = vmatpush.bf16.msrb.mxu2 %v2151_v49 }
 0x378   : > { %2207 = vmatpush.bf16.msrb.mxu3 %v2156_v56 }
 0x379   : > { %2196 = vmatpush.bf16.msrb.mxu2 %v4141_v16 }
 0x37c   : > { %2208 = vmatpush.bf16.msrb.mxu3 %v2152_v44 }
 0x37d   : > { %2197 = vmatpush.bf16.msrb.mxu2 %v4129_v40  ;;  %v2222_v40 = vpop.permute.xlu0 %2221 }
 0x380   : > { %2209 = vmatpush.bf16.msrb.mxu3 %v4146_v45 }
 0x381   : > { %2198 = vmatpush.bf16.msrb.mxu2 %v4117_v55 }
 0x384   : > { %2210 = vmatpush.bf16.msrb.mxu3 %v4132_v34 }
 0x385   : > { %v2175_v47 = vpop.f32.mrf.mxu0  ;;  %2199 = vmatpush.bf16.msrb.mxu2 %v4093_v39 }
 0x386   : > { %v2224_v7 = vadd.f32 %v2222_v40, %v2175_v47 }
 0x388   : > { %2211 = vmatpush.bf16.msrb.mxu3 %v4123_v28  ;;  %2200 = vmatmul.bf16.vlgmr.msrb.gmra.mxu2 %v4111_v24 }
 0x38c   : > { %v2188_v16 = vpop.f32.mrf.mxu1  ;;  %2212 = vmatpush.bf16.msrb.mxu3 %v4100_v11 }
 0x38d   : > { %v2225_v55 = vadd.f32 %v2222_v40, %v2188_v16  ;;  %v2177_v45 = vpop.f32.mrf.mxu0 }
 0x38f   : > { %v2232_v39 = vrot.slane %v2225_v55, 4  ;;  %2213 = vmatmul.bf16.vlgmr.msrb.gmra.mxu3 %v4111_v24 }
 0x391   : > { %v2235_v28 = vsel %vm2234_vm0, %v2224_v7, %v2232_v39 }
 0x392   : > { %2239 = vst [vmem:[%s327_s22] sm:$0x77] %v2235_v28 }
 0x394   : > { %v2190_v34 = vpop.f32.mrf.mxu1 }
 0x40b   : > { %v2201_v37 = vpop.f32.mrf.mxu2 }
 0x40c   : > { %v2226_v35 = vadd.f32 %v2222_v40, %v2201_v37 }
 0x412   : > { %v2214_v62 = vpop.f32.mrf.mxu3 }
 0x413   : > { %v2227_v54 = vadd.f32 %v2222_v40, %v2214_v62  ;;  %v2203_v1 = vpop.f32.mrf.mxu2 }
 0x415   : > { %v2233_v11 = vrot.slane %v2227_v54, 4 }
 0x417   : > { %v2236_v17 = vsel %vm2234_vm0, %v2226_v35, %v2233_v11 }
 0x418   : > { %2240 = vst [vmem:[%s327_s22 + $0x8] sm:$0x77] %v2236_v17 }
 0x41a   : > { %v2216_v51 = vpop.f32.mrf.mxu3 }
 0x41b PF: > { %s20_s8 = sadd.s32 1, %s2688_s8   ;;  %s4416_s27 = sld [smem:[#allocation6_spill]] }
 0x41c   : > { %p17_p2 = scmp.ge.s32.totalorder %s20_s8, 6   ;;  %s4417_s29 = sld [smem:[#allocation7_spill]] }
 0x41d   : > { %s4418_s23 = sld [smem:[#allocation8_spill]]  ;;  %s4419_s24 = smov %s2664_s25 }
 0x41e   : > { %s4420_s25 = smov %s2668_s26  ;;  %s4421_s26 = smov %s2801_s21 }
 0x41f   : > { %s4422_s28 = smov %s2684_s30  ;;  %19 = sbr.rel (!%p17_p2) target bundleno = 7 (0x7), region = 88 }
 0x423   : > { %s4423_s30 = smov %s4418_s23 }
 0x424   :  { %2271 = vsyncpa [#allocation3], 1 }
 0x425   :  { %2273 = vsyncpa [#allocation3 + $0x1], 1 }

</bundles_post_ra>
